<compile_context>
chip_gen: v5e
topology: v5e:2x2
jax: 0.10.0
libtpu: 0.0.40
codegen_flags: <defaults>
</compile_context>

<pallas_src>
import functools

import jax
import jax.numpy as jnp
import numpy as np
from jax import lax
from jax.experimental import pallas as pl
from jax.experimental.pallas import tpu as pltpu


# ----------------------------------------------------------------------------
# Fake-quantization parameters (qfp.quantize_data emulation)
# ----------------------------------------------------------------------------
QUANT_BITS = 8
INTLEN = 3  # quant_table[self.name]  (per-layer integer bit length)


def _quant_params(intlen: int, bits: int = QUANT_BITS):
    fraclen = bits - 1 - intlen
    scale = float(2.0 ** (-fraclen))
    qmin = float(-(2 ** (bits - 1)))
    qmax = float(2 ** (bits - 1) - 1)
    return scale, qmin, qmax


def _round_up(v: int, m: int) -> int:
    return (v + m - 1) // m * m


# ----------------------------------------------------------------------------
# Pallas kernel: fake-quant (once per image, bf16 scratch) + conv taps + bias
# ----------------------------------------------------------------------------
def _conv_quant_kernel(x_ref, w_ref, b_ref, o_ref, q_ref, *,
                       taps, Rc, n_chunks, inv_scale, qmin, qmax):
    """One (image n, O-block j) grid step.

    x_ref: (1, L, Ck)    f32  flattened zero-padded image (KW-concat or plain C)
    w_ref: (n_w, Ck, TO) bf16 conv weight with the quant scale folded in
    b_ref: (1, TO)       f32  bias (zero-padded to TO lanes)
    o_ref: (1, R, TO)         output rows r = h*Wp + w (cols w >= OW = scratch)
    q_ref: (L, Ck)       bf16 per-image fake-quantized codes (VMEM scratch)
    """
    TO = o_ref.shape[2]

    # --- fake-quantize the whole image ONCE per image (only at j == 0) -------
    # Codes are integers in [-128, 127] -> the bf16 cast is lossless, and every
    # later O-block / tap just reads the bf16 scratch (half the load bytes, no
    # repeated VALU round/clip chains).
    # TODO(synk): exact qfp.quantize_data source unavailable; assumes
    # round-to-nearest + clip to [-128, 127] with scale 2^-(7-intlen).
    @pl.when(pl.program_id(1) == 0)
    def _():
        codes = jnp.clip(jnp.round(x_ref[0] * inv_scale), qmin, qmax)
        q_ref[...] = codes.astype(jnp.bfloat16)

    bias_row = b_ref[...]                                  # (1, TO) f32

    def chunk(ci, carry):
        start = pl.multiple_of(ci * Rc, 8)                 # Rc, Wp are 8-aligned
        # Bias-initialized f32 accumulator; taps accumulate as values (MRB /
        # registers), the output block is written exactly once per chunk.
        acc = jnp.broadcast_to(bias_row, (Rc, TO))
        for off, widx in taps:                             # static tap list
            lhs = q_ref[pl.ds(start + off, Rc), :]         # (Rc, Ck) bf16
            acc = acc + jnp.dot(lhs, w_ref[widx],
                                preferred_element_type=jnp.float32)
        o_ref[0, pl.ds(start, Rc), :] = acc.astype(o_ref.dtype)
        return carry

    lax.fori_loop(0, n_chunks, chunk, 0, unroll=n_chunks <= 4)


def conv_quant_forward(x, weight, bias, *, stride=1, padding=1, intlen=INTLEN,
                       block_o=128, row_chunk=256, use_kw_concat=None,
                       out_dtype=jnp.float32, data_format="NCHW"):
    """ConvQuant.forward: fake-quantize the input, then conv2d (+ bias).

    x:      (N, C, H, W) f32 (NCHW, PyTorch layout) or (N, H, W, C) if NHWC
    weight: (O, C, KH, KW) f32
    bias:   (O,) f32
    returns (N, O, OH, OW) (or NHWC if data_format == "NHWC"), dtype out_dtype.

    block_o: output-lane tile; 128 matches v5e's 4x128x128 MXU, sweep 256 on
    v6e/v7x (2x256x256 MXU).  out_dtype=bf16 halves output HBM/vst traffic.
    """
    if stride != 1:
        # TODO(synk): strided conv needs a strided output-row mapping; only the
        # stride-1 fused path (the configuration used by this module) exists.
        raise NotImplementedError("fused ConvQuant kernel implements stride=1")

    if data_format == "NCHW":
        N, C, H, W = x.shape
        x_nhwc = jnp.transpose(x, (0, 2, 3, 1))
    else:
        N, H, W, C = x.shape
        x_nhwc = x
    O, Cw, KH, KW = weight.shape
    assert Cw == C, "channel mismatch"

    if use_kw_concat is None:
        # Wrapper-side KW im2col costs ~KW x input bytes; only worth it when C
        # is small (first convs) where MXU K-width would otherwise be starved.
        use_kw_concat = (C * KW) <= 256

    Hp = H + 2 * padding
    Wp = _round_up(W + 2 * padding, 8)      # sublane-aligned flat row stride
    OH = Hp - KH + 1
    OW = W + 2 * padding - KW + 1
    R_valid = OH * Wp                       # rows holding real outputs

    # In-kernel row chunking: one accumulator + one store per chunk.
    n_chunks = pl.cdiv(R_valid, row_chunk)
    Rc = _round_up(pl.cdiv(R_valid, n_chunks), 8)
    R = n_chunks * Rc                       # output rows incl. tail scratch

    if use_kw_concat:
        Ck = KW * C                         # matmul K = 3C, 3 aligned taps
        n_w = KH
        L_in = R + (KH - 1) * Wp
        taps = tuple((kh * Wp, kh) for kh in range(KH))
    else:
        Ck = C                              # 9 taps straight off the scratch
        n_w = KH * KW
        L_in = _round_up(R + (KH - 1) * Wp + (KW - 1), 8)
        taps = tuple((kh * Wp + kw, kh * KW + kw)
                     for kh in range(KH) for kw in range(KW))

    Opad = _round_up(O, block_o)            # lane-dense output width
    scale, qmin, qmax = _quant_params(intlen)

    # --- wrapper glue: ONE fused pad, flatten (H, W) with row stride Wp ------
    rows_flat = L_in + (KW - 1)
    Hp_ext = pl.cdiv(rows_flat, Wp)
    x_pad = jnp.pad(
        x_nhwc,
        ((0, 0),
         (padding, Hp_ext - H - padding),
         (padding, Wp - W - padding),
         (0, 0)))
    x_flat = x_pad.reshape(N, Hp_ext * Wp, C)
    if use_kw_concat:
        x_in = jnp.concatenate(
            [x_flat[:, kw:kw + L_in, :] for kw in range(KW)], axis=-1)
    else:
        x_in = x_flat[:, :L_in, :]

    # Weight: quant scale folded in once, bf16, lane-padded O.
    w_t = jnp.transpose(weight, (2, 3, 1, 0))               # (KH, KW, C, O)
    w_eff = w_t.reshape(n_w, Ck, O) * jnp.float32(scale)
    w_eff = jnp.pad(w_eff, ((0, 0), (0, 0), (0, Opad - O))).astype(jnp.bfloat16)
    b_eff = jnp.pad(bias.astype(jnp.float32), (0, Opad - O)).reshape(1, Opad)

    kernel = functools.partial(
        _conv_quant_kernel, taps=taps, Rc=Rc, n_chunks=n_chunks,
        inv_scale=1.0 / scale, qmin=qmin, qmax=qmax)

    out_bytes = jnp.dtype(out_dtype).itemsize
    cost = pl.CostEstimate(
        flops=2 * N * len(taps) * R * Ck * Opad,
        transcendentals=0,
        bytes_accessed=(N * L_in * Ck * 4 + N * n_w * Ck * Opad * 2
                        + Opad * 4 + N * R * Opad * out_bytes))

    # TODO(synk): for large images on v7x (64 MiB VMEM/TC) add a grid axis over
    # output-row tiles (input halo via element-offset blocks or a manual DMA)
    # so the per-step input slab / output block / bf16 scratch stay in budget,
    # and mark that axis "parallel" so both TCs get work when N == 1.
    out_flat = pl.pallas_call(
        kernel,
        out_shape=jax.ShapeDtypeStruct((N, R, Opad), out_dtype),
        grid_spec=pltpu.PrefetchScalarGridSpec(
            num_scalar_prefetch=0,
            grid=(N, Opad // block_o),
            in_specs=[
                pl.BlockSpec((1, L_in, Ck), lambda n, j: (n, 0, 0)),
                pl.BlockSpec((n_w, Ck, block_o), lambda n, j: (0, 0, j)),
                pl.BlockSpec((1, block_o), lambda n, j: (0, j)),
            ],
            out_specs=pl.BlockSpec((1, R, block_o), lambda n, j: (n, 0, j)),
            scratch_shapes=[pltpu.VMEM((L_in, Ck), jnp.bfloat16)],
        ),
        compiler_params=pltpu.CompilerParams(
            # j MUST be "arbitrary": the bf16 scratch written at j == 0 is
            # consumed by every later j step of the same image.
            dimension_semantics=("parallel", "arbitrary"),
            vmem_limit_bytes=48 * 1024 * 1024,
        ),
        cost_estimate=cost,
    )(x_in, w_eff, b_eff)

    # Drop wrap-around columns / tail rows and the O padding; restore layout.
    out = out_flat[:, :R_valid, :O].reshape(N, OH, Wp, O)[:, :, :OW, :]
    if data_format == "NCHW":
        out = jnp.transpose(out, (0, 3, 1, 2))
    return out


# ----------------------------------------------------------------------------
# Demo / self-check
# ----------------------------------------------------------------------------
if __name__ == "__main__":
    key = jax.random.PRNGKey(0)
    k_x, k_w, k_b = jax.random.split(key, 3)

    # Conv2d(4 -> 8, 3x3, stride=1, pad=1) on a (2, 4, 16, 16) input.
    N, C, H, W = 2, 4, 16, 16
    O, KH, KW = 8, 3, 3

    x = jax.random.normal(k_x, (N, C, H, W), dtype=jnp.float32)
    weight = 0.1 * jax.random.normal(k_w, (O, C, KH, KW), dtype=jnp.float32)
    bias = 0.1 * jax.random.normal(k_b, (O,), dtype=jnp.float32)

    fwd_concat = jax.jit(functools.partial(
        conv_quant_forward, stride=1, padding=1, intlen=INTLEN,
        use_kw_concat=True))
    fwd_taps = jax.jit(functools.partial(
        conv_quant_forward, stride=1, padding=1, intlen=INTLEN,
        use_kw_concat=False))

    out_concat = jax.block_until_ready(fwd_concat(x, weight, bias))
    out_taps = jax.block_until_ready(fwd_taps(x, weight, bias))

    # ---------------- references ----------------
    scale, qmin, qmax = _quant_params(INTLEN)
    codes = jnp.clip(jnp.round(x / scale), qmin, qmax)   # integer codes
    xq = codes * scale                                   # fake-quantized input

    def conv_ref(lhs, w):
        return lax.conv_general_dilated(
            lhs, w, window_strides=(1, 1), padding=((1, 1), (1, 1)),
            dimension_numbers=("NCHW", "OIHW", "NCHW"),
            precision=lax.Precision.HIGHEST,
            preferred_element_type=jnp.float32)

    b4 = bias.reshape(1, O, 1, 1)

    # (a) reference matching the kernel's math (quant scale folded into a bf16
    #     weight, f32 accumulation) -> tight tolerance.
    w_eff_ref = (weight * scale).astype(jnp.bfloat16).astype(jnp.float32)
    ref_kernel_math = conv_ref(codes, w_eff_ref) + b4
    # (b) exact module semantics in full f32 (only the bf16 weight rounding
    #     differs) -> loose tolerance.
    ref_exact = conv_ref(xq, weight) + b4

    for out in (out_concat, out_taps):
        np.testing.assert_allclose(np.asarray(out), np.asarray(ref_kernel_math),
                                   rtol=1e-3, atol=1e-3)
        np.testing.assert_allclose(np.asarray(out), np.asarray(ref_exact),
                                   rtol=2e-2, atol=2e-2)

    print("KERNEL_OK")
</pallas_src>

<mosaic_0001>
module attributes {stable_mosaic.version = 11 : i64} {
  func.func @_conv_quant_kernel(%arg0: i32, %arg1: i32, %arg2: memref<1x432x12xf32, #tpu.memory_space<vmem>>, %arg3: memref<3x12x128xbf16, #tpu.memory_space<vmem>>, %arg4: memref<1x128xf32, #tpu.memory_space<vmem>>, %arg5: memref<1x384x128xf32, #tpu.memory_space<vmem>>, %arg6: memref<432x12xbf16, #tpu.memory_space<vmem>>) attributes {dimension_semantics = [#tpu.dimension_semantics<parallel>, #tpu.dimension_semantics<arbitrary>], iteration_bounds = array<i64: 2, 1>, scalar_prefetch = 0 : i64, scratch_operands = 1 : i64, tpu.core_type = #tpu.core_type<tc>, window_params = [{transform_indices = @transform_0, window_bounds = array<i64: 1, 432, 12>}, {transform_indices = @transform_1, window_bounds = array<i64: 3, 12, 128>}, {transform_indices = @transform_2, window_bounds = array<i64: 1, 128>}, {transform_indices = @transform_3, window_bounds = array<i64: 1, 384, 128>}]} {
    %c0_i32 = arith.constant 0 : i32
    %0 = arith.cmpi eq, %arg1, %c0_i32 : i32
    %1 = arith.extui %0 : i1 to i32
    %c0_i32_0 = arith.constant 0 : i32
    %2 = arith.cmpi ne, %1, %c0_i32_0 : i32
    scf.if %2 {
      %c0_39 = arith.constant 0 : index
      %c0_40 = arith.constant 0 : index
      %c0_41 = arith.constant 0 : index
      %62 = vector.load %arg2[%c0_39, %c0_40, %c0_41] : memref<1x432x12xf32, #tpu.memory_space<vmem>>, vector<1x432x12xf32>
      %63 = vector.shape_cast %62 : vector<1x432x12xf32> to vector<432x12xf32>
      %cst_42 = arith.constant 1.600000e+01 : f32
      %64 = vector.broadcast %cst_42 : f32 to vector<432x12xf32>
      %65 = arith.mulf %63, %64 : vector<432x12xf32>
      %66 = math.roundeven %65 : vector<432x12xf32>
      %cst_43 = arith.constant -1.280000e+02 : f32
      %cst_44 = arith.constant 1.270000e+02 : f32
      %67 = vector.broadcast %cst_43 : f32 to vector<432x12xf32>
      %68 = arith.maximumf %67, %66 : vector<432x12xf32>
      %69 = vector.broadcast %cst_44 : f32 to vector<432x12xf32>
      %70 = arith.minimumf %69, %68 : vector<432x12xf32>
      %71 = arith.truncf %70 : vector<432x12xf32> to vector<432x12xbf16>
      %c0_45 = arith.constant 0 : index
      %c0_46 = arith.constant 0 : index
      %72 = vector.load %arg6[%c0_45, %c0_46] : memref<432x12xbf16, #tpu.memory_space<vmem>>, vector<432x12xbf16>
      tpu.vector_store %arg6[%c0_45, %c0_46], %71 {strides = array<i32>} : memref<432x12xbf16, #tpu.memory_space<vmem>>, vector<432x12xbf16>,
    } else {
    }
    %c0 = arith.constant 0 : index
    %c0_1 = arith.constant 0 : index
    %3 = vector.load %arg4[%c0, %c0_1] : memref<1x128xf32, #tpu.memory_space<vmem>>, vector<1x128xf32>
    %c0_i32_2 = arith.constant 0 : i32
    %c192_i32 = arith.constant 192 : i32
    %4 = arith.muli %c0_i32_2, %c192_i32 : i32
    %5 = tpu.assume_multiple %4, 8 : i32
    %6 = vector.shape_cast %3 : vector<1x128xf32> to vector<1x128xf32>
    %7 = vector.broadcast %6 : vector<1x128xf32> to vector<192x128xf32>
    %c0_i32_3 = arith.constant 0 : i32
    %8 = arith.addi %5, %c0_i32_3 : i32
    %9 = arith.index_cast %8 : i32 to index
    %c0_4 = arith.constant 0 : index
    %10 = vector.load %arg6[%9, %c0_4] : memref<432x12xbf16, #tpu.memory_space<vmem>>, vector<192x12xbf16>
    %c0_5 = arith.constant 0 : index
    %c0_6 = arith.constant 0 : index
    %c0_7 = arith.constant 0 : index
    %11 = vector.load %arg3[%c0_5, %c0_6, %c0_7] : memref<3x12x128xbf16, #tpu.memory_space<vmem>>, vector<1x12x128xbf16>
    %12 = vector.shape_cast %11 : vector<1x12x128xbf16> to vector<12x128xbf16>
    %cst = arith.constant dense<0.000000e+00> : vector<192x128xf32>
    %13 = tpu.matmul %10, %12, %cst {dimension_numbers = #tpu.dot_dimension_numbers<[1], [0], [0], [1], [0, 0, 1, 1], [], []>} : vector<192x12xbf16>, vector<12x128xbf16>, vector<192x128xf32> -> vector<192x128xf32>
    %14 = arith.addf %7, %13 : vector<192x128xf32>
    %c24_i32 = arith.constant 24 : i32
    %15 = arith.addi %5, %c24_i32 : i32
    %16 = arith.index_cast %15 : i32 to index
    %c0_8 = arith.constant 0 : index
    %17 = vector.load %arg6[%16, %c0_8] : memref<432x12xbf16, #tpu.memory_space<vmem>>, vector<192x12xbf16>
    %c1 = arith.constant 1 : index
    %c0_9 = arith.constant 0 : index
    %c0_10 = arith.constant 0 : index
    %18 = vector.load %arg3[%c1, %c0_9, %c0_10] : memref<3x12x128xbf16, #tpu.memory_space<vmem>>, vector<1x12x128xbf16>
    %19 = vector.shape_cast %18 : vector<1x12x128xbf16> to vector<12x128xbf16>
    %cst_11 = arith.constant dense<0.000000e+00> : vector<192x128xf32>
    %20 = tpu.matmul %17, %19, %cst_11 {dimension_numbers = #tpu.dot_dimension_numbers<[1], [0], [0], [1], [0, 0, 1, 1], [], []>} : vector<192x12xbf16>, vector<12x128xbf16>, vector<192x128xf32> -> vector<192x128xf32>
    %21 = arith.addf %14, %20 : vector<192x128xf32>
    %c48_i32 = arith.constant 48 : i32
    %22 = arith.addi %5, %c48_i32 : i32
    %23 = arith.index_cast %22 : i32 to index
    %c0_12 = arith.constant 0 : index
    %24 = vector.load %arg6[%23, %c0_12] : memref<432x12xbf16, #tpu.memory_space<vmem>>, vector<192x12xbf16>
    %c2 = arith.constant 2 : index
    %c0_13 = arith.constant 0 : index
    %c0_14 = arith.constant 0 : index
    %25 = vector.load %arg3[%c2, %c0_13, %c0_14] : memref<3x12x128xbf16, #tpu.memory_space<vmem>>, vector<1x12x128xbf16>
    %26 = vector.shape_cast %25 : vector<1x12x128xbf16> to vector<12x128xbf16>
    %cst_15 = arith.constant dense<0.000000e+00> : vector<192x128xf32>
    %27 = tpu.matmul %24, %26, %cst_15 {dimension_numbers = #tpu.dot_dimension_numbers<[1], [0], [0], [1], [0, 0, 1, 1], [], []>} : vector<192x12xbf16>, vector<12x128xbf16>, vector<192x128xf32> -> vector<192x128xf32>
    %28 = arith.addf %21, %27 : vector<192x128xf32>
    %c0_16 = arith.constant 0 : index
    %29 = arith.index_cast %5 : i32 to index
    %c0_17 = arith.constant 0 : index
    %30 = vector.load %arg5[%c0_16, %29, %c0_17] : memref<1x384x128xf32, #tpu.memory_space<vmem>>, vector<1x192x128xf32>
    %31 = vector.shape_cast %30 : vector<1x192x128xf32> to vector<192x128xf32>
    %32 = vector.shape_cast %28 : vector<192x128xf32> to vector<1x192x128xf32>
    tpu.vector_store %arg5[%c0_16, %29, %c0_17], %32 {strides = array<i32>} : memref<1x384x128xf32, #tpu.memory_space<vmem>>, vector<1x192x128xf32>,
    %c1_i32 = arith.constant 1 : i32
    %c192_i32_18 = arith.constant 192 : i32
    %33 = arith.muli %c1_i32, %c192_i32_18 : i32
    %34 = tpu.assume_multiple %33, 8 : i32
    %35 = vector.shape_cast %3 : vector<1x128xf32> to vector<1x128xf32>
    %36 = vector.broadcast %35 : vector<1x128xf32> to vector<192x128xf32>
    %c0_i32_19 = arith.constant 0 : i32
    %37 = arith.addi %34, %c0_i32_19 : i32
    %38 = arith.index_cast %37 : i32 to index
    %c0_20 = arith.constant 0 : index
    %39 = vector.load %arg6[%38, %c0_20] : memref<432x12xbf16, #tpu.memory_space<vmem>>, vector<192x12xbf16>
    %c0_21 = arith.constant 0 : index
    %c0_22 = arith.constant 0 : index
    %c0_23 = arith.constant 0 : index
    %40 = vector.load %arg3[%c0_21, %c0_22, %c0_23] : memref<3x12x128xbf16, #tpu.memory_space<vmem>>, vector<1x12x128xbf16>
    %41 = vector.shape_cast %40 : vector<1x12x128xbf16> to vector<12x128xbf16>
    %cst_24 = arith.constant dense<0.000000e+00> : vector<192x128xf32>
    %42 = tpu.matmul %39, %41, %cst_24 {dimension_numbers = #tpu.dot_dimension_numbers<[1], [0], [0], [1], [0, 0, 1, 1], [], []>} : vector<192x12xbf16>, vector<12x128xbf16>, vector<192x128xf32> -> vector<192x128xf32>
    %43 = arith.addf %36, %42 : vector<192x128xf32>
    %c24_i32_25 = arith.constant 24 : i32
    %44 = arith.addi %34, %c24_i32_25 : i32
    %45 = arith.index_cast %44 : i32 to index
    %c0_26 = arith.constant 0 : index
    %46 = vector.load %arg6[%45, %c0_26] : memref<432x12xbf16, #tpu.memory_space<vmem>>, vector<192x12xbf16>
    %c1_27 = arith.constant 1 : index
    %c0_28 = arith.constant 0 : index
    %c0_29 = arith.constant 0 : index
    %47 = vector.load %arg3[%c1_27, %c0_28, %c0_29] : memref<3x12x128xbf16, #tpu.memory_space<vmem>>, vector<1x12x128xbf16>
    %48 = vector.shape_cast %47 : vector<1x12x128xbf16> to vector<12x128xbf16>
    %cst_30 = arith.constant dense<0.000000e+00> : vector<192x128xf32>
    %49 = tpu.matmul %46, %48, %cst_30 {dimension_numbers = #tpu.dot_dimension_numbers<[1], [0], [0], [1], [0, 0, 1, 1], [], []>} : vector<192x12xbf16>, vector<12x128xbf16>, vector<192x128xf32> -> vector<192x128xf32>
    %50 = arith.addf %43, %49 : vector<192x128xf32>
    %c48_i32_31 = arith.constant 48 : i32
    %51 = arith.addi %34, %c48_i32_31 : i32
    %52 = arith.index_cast %51 : i32 to index
    %c0_32 = arith.constant 0 : index
    %53 = vector.load %arg6[%52, %c0_32] : memref<432x12xbf16, #tpu.memory_space<vmem>>, vector<192x12xbf16>
    %c2_33 = arith.constant 2 : index
    %c0_34 = arith.constant 0 : index
    %c0_35 = arith.constant 0 : index
    %54 = vector.load %arg3[%c2_33, %c0_34, %c0_35] : memref<3x12x128xbf16, #tpu.memory_space<vmem>>, vector<1x12x128xbf16>
    %55 = vector.shape_cast %54 : vector<1x12x128xbf16> to vector<12x128xbf16>
    %cst_36 = arith.constant dense<0.000000e+00> : vector<192x128xf32>
    %56 = tpu.matmul %53, %55, %cst_36 {dimension_numbers = #tpu.dot_dimension_numbers<[1], [0], [0], [1], [0, 0, 1, 1], [], []>} : vector<192x12xbf16>, vector<12x128xbf16>, vector<192x128xf32> -> vector<192x128xf32>
    %57 = arith.addf %50, %56 : vector<192x128xf32>
    %c0_37 = arith.constant 0 : index
    %58 = arith.index_cast %34 : i32 to index
    %c0_38 = arith.constant 0 : index
    %59 = vector.load %arg5[%c0_37, %58, %c0_38] : memref<1x384x128xf32, #tpu.memory_space<vmem>>, vector<1x192x128xf32>
    %60 = vector.shape_cast %59 : vector<1x192x128xf32> to vector<192x128xf32>
    %61 = vector.shape_cast %57 : vector<192x128xf32> to vector<1x192x128xf32>
    tpu.vector_store %arg5[%c0_37, %58, %c0_38], %61 {strides = array<i32>} : memref<1x384x128xf32, #tpu.memory_space<vmem>>, vector<1x192x128xf32>,
    %c2_i32 = arith.constant 2 : i32
    return
  }
  func.func @transform_0(%arg0: i32, %arg1: i32) -> (i32, i32, i32) {
    %c0_i32 = arith.constant 0 : i32
    %c0_i32_0 = arith.constant 0 : i32
    %c0_i32_1 = arith.constant 0 : i32
    return %arg0, %c0_i32, %c0_i32_0 : i32, i32, i32
  }
  func.func @transform_1(%arg0: i32, %arg1: i32) -> (i32, i32, i32) {
    %c0_i32 = arith.constant 0 : i32
    %c0_i32_0 = arith.constant 0 : i32
    %c0_i32_1 = arith.constant 0 : i32
    return %c0_i32, %c0_i32_0, %arg1 : i32, i32, i32
  }
  func.func @transform_2(%arg0: i32, %arg1: i32) -> (i32, i32) {
    %c0_i32 = arith.constant 0 : i32
    %c0_i32_0 = arith.constant 0 : i32
    return %c0_i32, %arg1 : i32, i32
  }
  func.func @transform_3(%arg0: i32, %arg1: i32) -> (i32, i32, i32) {
    %c0_i32 = arith.constant 0 : i32
    %c0_i32_0 = arith.constant 0 : i32
    return %arg0, %c0_i32, %arg1 : i32, i32, i32
  }
}

</mosaic_0001>

<bundles_post_ra>
// kernel: conv_quant_forward.1
= control target key start
LH: loop header
LB: loop body
LE: loop exit
PB: predicated region body
PF: predicated region fallthrough
CT: control target
= control target key end

     0   :  { %s3146_s12 = smov 0   ;;  %s3148_s13 = smov 0   ;;  %s3797_s0 = inlined_call_operand.vmem [shape: f32[2,432,12], index: 0, kind: input, shape index: {}]   ;;  %s3798_s1 = inlined_call_operand.vmem [shape: bf16[3,12,128], index: 1, kind: input, shape index: {}]   ;;  %s3799_s2 = inlined_call_operand.vmem [shape: f32[1,128], index: 2, kind: input, shape index: {}]   ;;  %s3800_s3 = inlined_call_operand.vmem [shape: f32[2,384,128], index: 3, kind: output, shape index: {}]  }
   0x1   :  { %s3150_s14 = smov 0  }
   0x2 LB: > { %s25_s15 = sadd.s32 1, %s3120_s13  ;;  %p2141_p0 = scmp.ge.s32.totalorder %s3124_s14, 1  ;;  %s3124_s14 = sphi %s3150_s14, %s13_s14   ;;  %s3120_s13 = sphi %s3148_s13, %s3856_s13   ;;  %s3116_s12 = sphi %s3146_s12, %s3855_s12  }
   0x3   : > { %p27_p1 = scmp.ge.s32.totalorder %s25_s15, 2  ;;  %p168_p2 = scmp.lt.s32.totalorder %s3124_s14, 3 }
   0x5   : > { %s3858_s15 = smov (%p27_p1, %s25_s15), 0  ;;  %p169_p3 = pnand %p2141_p0, %p168_p2 }
   0x6   : > { %p202_p4 = scmp.lt.s32.totalorder (!%p169_p3), %s3116_s12, 1 }
   0x7   : > { %172 = sbr.rel (%p169_p3) target bundleno = 475 (0x1db), region = 32 }
   0xc   : > { %v2194_v0 = vld [vmem:[%s3798_s1] sm:$0xf]  ;;  %v2574_v1 = vld [vmem:[%s3798_s1] sm:$0x30]  ;;  %vm738_vm0 = vcmask 1045504   ;;  %s3860_s12 = smov (!%p202_p4, %s3116_s12), 1 }
   0xd   : > { %v2195_v2 = vor.u32 %v2574_v1, %v2194_v0  ;;  %v2260_v3 = vld [vmem:[%s3798_s1 + $0x8] sm:$0xf]  ;;  %v2587_v4 = vld [vmem:[%s3798_s1 + $0x8] sm:$0x30]  ;;  %s2642_s24 = smul.u32 432, %s3860_s12  ;;  %vm551_vm4 = vcmask 93184  }
   0xe   : > { %v2261_v5 = vor.u32 %v2587_v4, %v2260_v3  ;;  %v2390_v52 = vld [vmem:[%s3798_s1] sm:$0xf]  ;;  %v2613_v57 = vld [vmem:[%s3798_s1] sm:$0x30]  ;;  %vm701_vm8 = vcmask 97280   ;;  %s2643_s23 = smul.u32 384, %s3860_s12 }
   0xf   : > { %v740_v6 = vsel %vm738_vm0, %v2195_v2, 0  ;;  %s3184_s27 = scalar_lea.vmem %s3797_s0, %s2642_s24  ;;  %v2639_v33 = vld [vmem:[%s3798_s1 + $0x10] sm:$0x30] }
  0x10   : > { %749 = vmatpush.bf16.msra.mxu0 %v740_v6  ;;  %2640 = vmatpush.bf16.msra.mxu2 %v740_v6  ;;  %v969_v7 = vsel %vm738_vm0, %v2261_v5, 0  ;;  %v227_v8 = vld [vmem:[%s3184_s27] sm:$0xff]  ;;  %v228_v9 = vld [vmem:[%s3184_s27 + $0x8] sm:$0xff]  ;;  %v242_v15 = vld [vmem:[%s3184_s27 + $0x78] sm:$0xff]  ;;  %v2391_v6 = vor.u32 %v2613_v57, %v2390_v52  ;;  %s3667_s12 = scalar_lea.vmem %s3800_s3, %s2643_s23 }
  0x11   : > { %2641 = vmatpush.bf16.msra.mxu3 %v969_v7  ;;  %978 = vmatpush.bf16.msra.mxu1 %v969_v7  ;;  %v239_v10 = vld [vmem:[%s3184_s27 + $0x60] sm:$0xff]  ;;  %v281_v11 = vmul.f32 16.0, %v227_v8  ;;  %v282_v12 = vmul.f32 16.0, %v228_v9  ;;  %v240_v13 = vld [vmem:[%s3184_s27 + $0x68] sm:$0xff]  ;;  %v3192_v18 = vmul.f32 16.0, %v242_v15  ;;  %v230_v62 = vld [vmem:[%s3184_s27 + $0x18] sm:$0xff] }
  0x12   : > { %v293_v14 = vmul.f32 16.0, %v239_v10  ;;  %v243_v16 = vld [vmem:[%s3184_s27 + $0x80] sm:$0xff]  ;;  %v294_v17 = vmul.f32 16.0, %v240_v13  ;;  %v229_v42 = vld [vmem:[%s3184_s27 + $0x10] sm:$0xff] }
  0x13   : > { %v3194_v19 = vmul.f32 16.0, %v243_v16  ;;  %v2644_v20 = vand.u32 2147483647, %v281_v11  ;;  %v2646_v21 = vcvt.f32.s32 %v281_v11  ;;  %v2649_v22 = vand.u32 2147483648, %v281_v11  ;;  %v231_v10 = vld [vmem:[%s3184_s27 + $0x20] sm:$0xff] }
  0x14   : > { %v2652_v23 = vand.u32 2147483647, %v282_v12  ;;  %v2654_v24 = vcvt.f32.s32 %v282_v12  ;;  %v2657_v25 = vand.u32 2147483648, %v282_v12  ;;  %v2740_v26 = vand.u32 2147483647, %v293_v14 }
  0x15   : > { %v2742_v27 = vcvt.f32.s32 %v293_v14  ;;  %vm3196_vm1 = vcmp.lt.f32.partialorder %v2644_v20, 8388608.0  ;;  %v2647_v29 = vcvt.s32.f32 %v2646_v21  ;;  %v2745_v31 = vand.u32 2147483648, %v293_v14  ;;  %v2600_v20 = vld [vmem:[%s3798_s1 + $0x10] sm:$0x30] }
  0x16   : > { %vm3200_vm2 = vcmp.lt.f32.partialorder %v2652_v23, 8388608.0  ;;  %v2655_v32 = vcvt.s32.f32 %v2654_v24  ;;  %vm3204_vm3 = vcmp.lt.f32.partialorder %v2740_v26, 8388608.0  ;;  %v2748_v35 = vand.u32 2147483647, %v294_v17  ;;  %v2456_v24 = vld [vmem:[%s3798_s1 + $0x8] sm:$0xf] }
  0x17   : > { %v2743_v34 = vcvt.s32.f32 %v2742_v27  ;;  %v2648_v36 = vand.u32 2147483647, %v2647_v29  ;;  %v2750_v37 = vcvt.f32.s32 %v294_v17  ;;  %v2753_v38 = vand.u32 2147483648, %v294_v17  ;;  %v2522_v29 = vld [vmem:[%s3798_s1 + $0x10] sm:$0xf] }
  0x18   : > { %v2764_v39 = vand.u32 2147483647, %v3192_v18  ;;  %v2656_v40 = vand.u32 2147483647, %v2655_v32  ;;  %vm3209_vm5 = vcmp.lt.f32.partialorder %v2748_v35, 8388608.0  ;;  %v2766_v43 = vcvt.f32.s32 %v3192_v18 }
  0x19   : > { %v2744_v41 = vand.u32 2147483647, %v2743_v34  ;;  %v2650_v44 = vor.u32 %v2649_v22, %v2648_v36  ;;  %v2751_v45 = vcvt.s32.f32 %v2750_v37  ;;  %v2769_v47 = vand.u32 2147483648, %v3192_v18 }
  0x1a   : > { %vm3214_vm6 = vcmp.lt.f32.partialorder %v2764_v39, 8388608.0  ;;  %v2658_v48 = vor.u32 %v2657_v25, %v2656_v40  ;;  %v2767_v50 = vcvt.s32.f32 %v2766_v43  ;;  %v2772_v51 = vand.u32 2147483647, %v3194_v19  ;;  %v2626_v25 = vld [vmem:[%s3798_s1 + $0x8] sm:$0x30]  ;;  %v241_v43 = vld [vmem:[%s3184_s27 + $0x70] sm:$0xff] }
  0x1b   : > { %v2746_v49 = vor.u32 %v2745_v31, %v2744_v41  ;;  %v2651_v53 = vsel %vm3196_vm1, %v2650_v44, %v281_v11  ;;  %v2752_v54 = vand.u32 2147483647, %v2751_v45  ;;  %v2774_v55 = vcvt.f32.s32 %v3194_v19 }
  0x1c   : > { %v2777_v56 = vand.u32 2147483648, %v3194_v19  ;;  %v2659_v58 = vsel %vm3200_vm2, %v2658_v48, %v282_v12  ;;  %v389_v59 = vmax.f32 %v2651_v53, -128.0  ;;  %v2768_v61 = vand.u32 2147483647, %v2767_v50  ;;  %v2326_v12 = vld [vmem:[%s3798_s1 + $0x10] sm:$0xf] }
  0x1d   : > { %v2747_v60 = vsel %vm3204_vm3, %v2746_v49, %v293_v14  ;;  %v390_v63 = vmax.f32 %v2659_v58, -128.0  ;;  %v2754_v0 = vor.u32 %v2753_v38, %v2752_v54  ;;  %vm3235_vm7 = vcmp.lt.f32.partialorder %v2772_v51, 8388608.0  ;;  %v244_v51 = vld [vmem:[%s3184_s27 + $0x88] sm:$0xff] }
  0x1e   : > { %v401_v1 = vmax.f32 %v2747_v60, -128.0  ;;  %v443_v3 = vmin.f32 %v389_v59, 127.0  ;;  %v2770_v4 = vor.u32 %v2769_v47, %v2768_v61  ;;  %v2775_v5 = vcvt.s32.f32 %v2774_v55 }
  0x1f   : > { %v444_v7 = vmin.f32 %v390_v63, 127.0  ;;  %v2755_v8 = vsel %vm3209_vm5, %v2754_v0, %v294_v17  ;;  %v3242_v11 = vmul.f32 16.0, %v230_v62  ;;  %v1446_v23 = vsel %vm738_vm0, %v2391_v6, 0  ;;  %v245_v0 = vld [vmem:[%s3184_s27 + $0x90] sm:$0xff] }
  0x20   : > { %v455_v9 = vmin.f32 %v401_v1, 127.0  ;;  %v497_v13 = vpack.c.bf16 %v443_v3, %v443_v3  ;;  %v402_v14 = vmax.f32 %v2755_v8, -128.0  ;;  %v2771_v15 = vsel %vm3214_vm6, %v2770_v4, %v3192_v18  ;;  %1455 = vmatpush.bf16.msrb.mxu3 %v1446_v23 }
  0x21   : > { %v2776_v16 = vand.u32 2147483647, %v2775_v5  ;;  %v498_v17 = vpack.c.bf16 %v444_v7, %v444_v7  ;;  %v404_v22 = vmax.f32 %v2771_v15, -128.0  ;;  %v3261_v27 = vmul.f32 16.0, %v231_v10 }
  0x22   : > { %v509_v21 = vpack.c.bf16 %v455_v9, %v455_v9  ;;  %552 = vst.msk [vmem:[#allocation2] sm:$0xf] %vm551_vm4, %v497_v13  ;;  %v456_v18 = vmin.f32 %v402_v14, 127.0  ;;  %v2668_v28 = vand.u32 2147483647, %v3242_v11  ;;  %v2670_v31 = vcvt.f32.s32 %v3242_v11 }
  0x23   : > { %v2778_v26 = vor.u32 %v2777_v56, %v2776_v16  ;;  %553 = vst.msk [vmem:[#allocation2 + $0x4] sm:$0xf] %vm551_vm4, %v498_v17  ;;  %v458_v30 = vmin.f32 %v404_v22, 127.0  ;;  %v2327_v32 = vor.u32 %v2600_v20, %v2326_v12  ;;  %v2673_v36 = vand.u32 2147483648, %v3242_v11 }
  0x24   : > { %v510_v34 = vpack.c.bf16 %v456_v18, %v456_v18  ;;  %564 = vst.msk [vmem:[#allocation2 + $0x30] sm:$0xf] %vm551_vm4, %v509_v21  ;;  %v2676_v37 = vand.u32 2147483647, %v3261_v27  ;;  %v2671_v40 = vcvt.s32.f32 %v2670_v31  ;;  %v2678_v41 = vcvt.f32.s32 %v3261_v27 }
  0x25   : > { %v2779_v35 = vsel %vm3235_vm7, %v2778_v26, %v3194_v19  ;;  %v512_v39 = vpack.c.bf16 %v458_v30, %v458_v30  ;;  %vm3282_vm9 = vcmp.lt.f32.partialorder %v2668_v28, 8388608.0  ;;  %v2681_v19 = vand.u32 2147483648, %v3261_v27 }
  0x26   : > { %v405_v38 = vmax.f32 %v2779_v35, -128.0  ;;  %565 = vst.msk [vmem:[#allocation2 + $0x34] sm:$0xf] %vm551_vm4, %v510_v34  ;;  %v1198_v45 = vsel %vm738_vm0, %v2327_v32, 0  ;;  %v2457_v46 = vor.u32 %v2626_v25, %v2456_v24  ;;  %v2672_v48 = vand.u32 2147483647, %v2671_v40 }
  0x27   : > { %567 = vst.msk [vmem:[#allocation2 + $0x3c] sm:$0xf] %vm551_vm4, %v512_v39  ;;  %v2679_v49 = vcvt.s32.f32 %v2678_v41  ;;  %1207 = vmatpush.bf16.msrb.mxu2 %v1198_v45  ;;  %v2523_v50 = vor.u32 %v2639_v33, %v2522_v29  ;;  %vm3290_vm10 = vcmp.lt.f32.partialorder %v2676_v37, 8388608.0  ;;  %v283_v54 = vmul.f32 16.0, %v229_v42  ;;  %v232_v25 = vld [vmem:[%s3184_s27 + $0x28] sm:$0xff]  ;;  %v233_v29 = vld [vmem:[%s3184_s27 + $0x30] sm:$0xff] }
  0x28   : > { %v459_v47 = vmin.f32 %v405_v38, 127.0  ;;  %v1674_v53 = vsel %vm738_vm0, %v2457_v46, 0  ;;  %v295_v55 = vmul.f32 16.0, %v241_v43  ;;  %v2674_v57 = vor.u32 %v2673_v36, %v2672_v48 }
  0x29   : > { %v2680_v58 = vand.u32 2147483647, %v2679_v49  ;;  %1683 = vmatpush.bf16.msrb.mxu0 %v1674_v53  ;;  %v1902_v59 = vsel %vm738_vm0, %v2523_v50, 0  ;;  %v2660_v61 = vand.u32 2147483647, %v283_v54  ;;  %v2662_v62 = vcvt.f32.s32 %v283_v54 }
  0x2a   : > { %v513_v56 = vpack.c.bf16 %v459_v47, %v459_v47  ;;  %v2562_v60 = vld [vmem:[#allocation2] sm:$0xff]  ;;  %1911 = vmatpush.bf16.msrb.mxu1 %v1902_v59  ;;  %v2665_v63 = vand.u32 2147483648, %v283_v54  ;;  %v3297_v1 = vmul.f32 16.0, %v244_v51  ;;  %v2675_v2 = vsel %vm3282_vm9, %v2674_v57, %v3242_v11 }
  0x2b   : > { %v2682_v3 = vor.u32 %v2681_v19, %v2680_v58  ;;  %v2756_v4 = vand.u32 2147483647, %v295_v55  ;;  %v2758_v5 = vcvt.f32.s32 %v295_v55  ;;  %2196 = vmatmul.msk.bf16.vlgmr.msra.gmra.mxu0 %vm701_vm8, %v2562_v60  ;;  %v392_v6 = vmax.f32 %v2675_v2, -128.0 }
  0x2c   : > { %568 = vst.msk [vmem:[#allocation2 + $0x40] sm:$0xf] %vm551_vm4, %v513_v56  ;;  %vm3304_vm11 = vcmp.lt.f32.partialorder %v2660_v61, 8388608.0  ;;  %v2663_v8 = vcvt.s32.f32 %v2662_v62  ;;  %v2761_v9 = vand.u32 2147483648, %v295_v55  ;;  %v299_v11 = vmul.f32 16.0, %v245_v0  ;;  %v234_v0 = vld [vmem:[%s3184_s27 + $0x38] sm:$0xff] }
  0x2d   : > { %v2568_v10 = vld [vmem:[#allocation2 + $0x30] sm:$0xff]  ;;  %v2683_v12 = vsel %vm3290_vm10, %v2682_v3, %v3261_v27  ;;  %v2759_v13 = vcvt.s32.f32 %v2758_v5  ;;  %v2780_v14 = vand.u32 2147483647, %v3297_v1  ;;  %v446_v16 = vmin.f32 %v392_v6, 127.0 }
  0x2e   : > { %v393_v15 = vmax.f32 %v2683_v12, -128.0  ;;  %v2664_v20 = vand.u32 2147483647, %v2663_v8  ;;  %v2782_v17 = vcvt.f32.s32 %v3297_v1  ;;  %2202 = vmatmul.msk.bf16.vlgmr.msra.gmra.mxu2 %vm701_vm8, %v2568_v10  ;;  %vm3314_vm12 = vcmp.lt.f32.partialorder %v2756_v4, 8388608.0 }
  0x2f   : > { %v2760_v22 = vand.u32 2147483647, %v2759_v13  ;;  %vm3318_vm13 = vcmp.lt.f32.partialorder %v2780_v14, 8388608.0  ;;  %v2785_v24 = vand.u32 2147483648, %v3297_v1  ;;  %v500_v26 = vpack.c.bf16 %v446_v16, %v446_v16 }
  0x30   : > { %v447_v18 = vmin.f32 %v393_v15, 127.0  ;;  %v2666_v27 = vor.u32 %v2665_v63, %v2664_v20  ;;  %v2783_v28 = vcvt.s32.f32 %v2782_v17  ;;  %v2788_v31 = vand.u32 2147483647, %v299_v11  ;;  %v235_v17 = vld [vmem:[%s3184_s27 + $0x40] sm:$0xff] }
  0x31   : > { %v2762_v30 = vor.u32 %v2761_v9, %v2760_v22  ;;  %v2790_v32 = vcvt.f32.s32 %v299_v11  ;;  %v2793_v33 = vand.u32 2147483648, %v299_v11  ;;  %555 = vst.msk [vmem:[#allocation2 + $0xc] sm:$0xf] %vm551_vm4, %v500_v26  ;;  %v286_v38 = vmul.f32 16.0, %v232_v25 }
  0x32   : > { %v501_v35 = vpack.c.bf16 %v447_v18, %v447_v18  ;;  %v2667_v36 = vsel %vm3304_vm11, %v2666_v27, %v283_v54  ;;  %v2784_v37 = vand.u32 2147483647, %v2783_v28  ;;  %v3330_v42 = vmul.f32 16.0, %v233_v29  ;;  %v246_v54 = vld [vmem:[%s3184_s27 + $0x98] sm:$0xff] }
  0x33   : > { %v2581_v34 = vld [vmem:[#allocation2 + $0x3c] sm:$0xff]  ;;  %v391_v39 = vmax.f32 %v2667_v36, -128.0  ;;  %v2763_v40 = vsel %vm3314_vm12, %v2762_v30, %v295_v55  ;;  %v2791_v41 = vcvt.s32.f32 %v2790_v32  ;;  %v2684_v19 = vand.u32 2147483647, %v286_v38 }
  0x34   : > { %2268 = vmatmul.msk.bf16.vlgmr.msra.gmra.mxu3 %vm701_vm8, %v2581_v34  ;;  %556 = vst.msk [vmem:[#allocation2 + $0x10] sm:$0xf] %vm551_vm4, %v501_v35  ;;  %v403_v43 = vmax.f32 %v2763_v40, -128.0  ;;  %v2786_v44 = vor.u32 %v2785_v24, %v2784_v37  ;;  %v2686_v45 = vcvt.f32.s32 %v286_v38  ;;  %vm3334_vm14 = vcmp.lt.f32.partialorder %v2788_v31, 8388608.0  ;;  %v247_v55 = vld [vmem:[%s3184_s27 + $0xa0] sm:$0xff] }
  0x35   : > { %v445_v46 = vmin.f32 %v391_v39, 127.0  ;;  %v2792_v48 = vand.u32 2147483647, %v2791_v41  ;;  %v2692_v49 = vand.u32 2147483647, %v3330_v42  ;;  %v2689_v53 = vand.u32 2147483648, %v286_v38 }
  0x36   : > { %v457_v50 = vmin.f32 %v403_v43, 127.0  ;;  %v2787_v51 = vsel %vm3318_vm13, %v2786_v44, %v3297_v1  ;;  %v2687_v52 = vcvt.s32.f32 %v2686_v45  ;;  %vm3344_vm15 = vcmp.lt.f32.partialorder %v2684_v19, 8388608.0  ;;  %v248_v45 = vld [vmem:[%s3184_s27 + $0xa8] sm:$0xff]  ;;  %v251_v43 = vld [vmem:[%s3184_s27 + $0xc0] sm:$0xff] }
  0x37   : > { %v499_v56 = vpack.c.bf16 %v445_v46, %v445_v46  ;;  %v2794_v57 = vor.u32 %v2793_v33, %v2792_v48  ;;  %v406_v58 = vmax.f32 %v2787_v51, -128.0  ;;  %vm3348_vm0 = vcmp.lt.f32.partialorder %v2692_v49, 8388608.0  ;;  %v249_v46 = vld [vmem:[%s3184_s27 + $0xb0] sm:$0xff] }
  0x38   : > { %v511_v60 = vpack.c.bf16 %v457_v50, %v457_v50  ;;  %v2688_v61 = vand.u32 2147483647, %v2687_v52  ;;  %v2694_v63 = vcvt.f32.s32 %v3330_v42  ;;  %v300_v3 = vmul.f32 16.0, %v246_v54 }
  0x39   : > { %554 = vst.msk [vmem:[#allocation2 + $0x8] sm:$0xf] %vm551_vm4, %v499_v56  ;;  %v2795_v1 = vsel %vm3334_vm14, %v2794_v57, %v299_v11  ;;  %v460_v2 = vmin.f32 %v406_v58, 127.0  ;;  %v301_v4 = vmul.f32 16.0, %v247_v55  ;;  %v2697_v8 = vand.u32 2147483648, %v3330_v42 }
  0x3a   : > { %566 = vst.msk [vmem:[#allocation2 + $0x38] sm:$0xf] %vm551_vm4, %v511_v60  ;;  %v407_v5 = vmax.f32 %v2795_v1, -128.0  ;;  %v2690_v6 = vor.u32 %v2689_v53, %v2688_v61  ;;  %v2695_v7 = vcvt.s32.f32 %v2694_v63  ;;  %v2796_v12 = vand.u32 2147483647, %v300_v3 }
  0x3b   : > { %v2575_v9 = vld [vmem:[#allocation2 + $0xc] sm:$0xff]  ;;  %v514_v10 = vpack.c.bf16 %v460_v2, %v460_v2  ;;  %v2798_v13 = vcvt.f32.s32 %v300_v3  ;;  %v3359_v14 = vmul.f32 16.0, %v234_v0  ;;  %v2804_v20 = vand.u32 2147483647, %v301_v4 }
  0x3c   : > { %v461_v15 = vmin.f32 %v407_v5, 127.0  ;;  %v2691_v11 = vsel %vm3344_vm15, %v2690_v6, %v286_v38  ;;  %v2696_v16 = vand.u32 2147483647, %v2695_v7  ;;  %2262 = vmatmul.msk.bf16.vlgmr.msra.gmra.mxu1 %vm701_vm8, %v2575_v9  ;;  %v2801_v23 = vand.u32 2147483648, %v300_v3 }
  0x3d   : > { %569 = vst.msk [vmem:[#allocation2 + $0x44] sm:$0xf] %vm551_vm4, %v514_v10  ;;  %v394_v21 = vmax.f32 %v2691_v11, -128.0  ;;  %v2799_v22 = vcvt.s32.f32 %v2798_v13  ;;  %v2806_v24 = vcvt.f32.s32 %v301_v4  ;;  %vm3366_vm1 = vcmp.lt.f32.partialorder %v2796_v12, 8388608.0  ;;  %v236_v13 = vld [vmem:[%s3184_s27 + $0x48] sm:$0xff] }
  0x3e   : > { %v515_v25 = vpack.c.bf16 %v461_v15, %v461_v15  ;;  %v2698_v18 = vor.u32 %v2697_v8, %v2696_v16  ;;  %v2809_v27 = vand.u32 2147483648, %v301_v4  ;;  %v289_v31 = vmul.f32 16.0, %v235_v17  ;;  %v237_v15 = vld [vmem:[%s3184_s27 + $0x50] sm:$0xff] }
  0x3f   : > { %v448_v28 = vmin.f32 %v394_v21, 127.0  ;;  %v2800_v29 = vand.u32 2147483647, %v2799_v22  ;;  %v2807_v30 = vcvt.s32.f32 %v2806_v24  ;;  %vm3374_vm2 = vcmp.lt.f32.partialorder %v2804_v20, 8388608.0  ;;  %v250_v24 = vld [vmem:[%s3184_s27 + $0xb8] sm:$0xff] }
  0x40   : > { %v2563_v32 = vld [vmem:[#allocation2 + $0x8] sm:$0xff]  ;;  %570 = vst.msk [vmem:[#allocation2 + $0x48] sm:$0xf] %vm551_vm4, %v515_v25  ;;  %v2699_v33 = vsel %vm3348_vm0, %v2698_v18, %v3330_v42  ;;  %v2700_v35 = vand.u32 2147483647, %v3359_v14  ;;  %v2702_v36 = vcvt.f32.s32 %v3359_v14  ;;  %v2705_v44 = vand.u32 2147483648, %v3359_v14 }
  0x41   : > { %v2569_v37 = vld [vmem:[#allocation2 + $0x38] sm:$0xff]  ;;  %v395_v38 = vmax.f32 %v2699_v33, -128.0  ;;  %v502_v39 = vpack.c.bf16 %v448_v28, %v448_v28  ;;  %v2802_v40 = vor.u32 %v2801_v23, %v2800_v29  ;;  %v2808_v41 = vand.u32 2147483647, %v2807_v30  ;;  %2197 = vmatmul.msk.bf16.gmra.mxu0 %vm701_vm8, %v2563_v32 }
  0x42   : > { %vm3381_vm3 = vcmp.lt.f32.partialorder %v2700_v35, 8388608.0  ;;  %v2703_v42 = vcvt.s32.f32 %v2702_v36  ;;  %v2710_v19 = vcvt.f32.s32 %v289_v31  ;;  %2203 = vmatmul.msk.bf16.gmra.mxu2 %vm701_vm8, %v2569_v37  ;;  %v2708_v50 = vand.u32 2147483647, %v289_v31 }
  0x43   : > { %v449_v47 = vmin.f32 %v395_v38, 127.0  ;;  %557 = vst.msk [vmem:[#allocation2 + $0x14] sm:$0xf] %vm551_vm4, %v502_v39  ;;  %v2803_v48 = vsel %vm3366_vm1, %v2802_v40, %v300_v3  ;;  %v2810_v49 = vor.u32 %v2809_v27, %v2808_v41  ;;  %v2713_v54 = vand.u32 2147483648, %v289_v31 }
  0x44   : > { %v408_v51 = vmax.f32 %v2803_v48, -128.0  ;;  %v2704_v52 = vand.u32 2147483647, %v2703_v42  ;;  %v2711_v53 = vcvt.s32.f32 %v2710_v19  ;;  %v302_v57 = vmul.f32 16.0, %v248_v45  ;;  %v2570_v37 = vld [vmem:[#allocation2 + $0x40] sm:$0xff] }
  0x45   : > { %v503_v55 = vpack.c.bf16 %v449_v47, %v449_v47  ;;  %v2811_v56 = vsel %vm3374_vm2, %v2810_v49, %v301_v4  ;;  %v303_v58 = vmul.f32 16.0, %v249_v46  ;;  %vm3395_vm5 = vcmp.lt.f32.partialorder %v2708_v50, 8388608.0 }
  0x46   : > { %v409_v59 = vmax.f32 %v2811_v56, -128.0  ;;  %v462_v60 = vmin.f32 %v408_v51, 127.0  ;;  %v2706_v61 = vor.u32 %v2705_v44, %v2704_v52  ;;  %v2712_v62 = vand.u32 2147483647, %v2711_v53 }
  0x47   : > { %v2582_v63 = vld [vmem:[#allocation2 + $0x44] sm:$0xff]  ;;  %558 = vst.msk [vmem:[#allocation2 + $0x18] sm:$0xf] %vm551_vm4, %v503_v55  ;;  %v2812_v1 = vand.u32 2147483647, %v302_v57  ;;  %v2814_v2 = vcvt.f32.s32 %v302_v57  ;;  %v2822_v3 = vcvt.f32.s32 %v303_v58  ;;  %v2817_v10 = vand.u32 2147483648, %v302_v57 }
  0x48   : > { %v463_v5 = vmin.f32 %v409_v59, 127.0  ;;  %v516_v4 = vpack.c.bf16 %v462_v60, %v462_v60  ;;  %v2707_v6 = vsel %vm3381_vm3, %v2706_v61, %v3359_v14  ;;  %v2714_v7 = vor.u32 %v2713_v54, %v2712_v62  ;;  %2269 = vmatmul.msk.bf16.gmra.mxu3 %vm701_vm8, %v2582_v63 }
  0x49   : > { %v396_v8 = vmax.f32 %v2707_v6, -128.0  ;;  %v2815_v9 = vcvt.s32.f32 %v2814_v2  ;;  %v2820_v12 = vand.u32 2147483647, %v303_v58  ;;  %v2823_v20 = vcvt.s32.f32 %v2822_v3 }
  0x4a   : > { %v517_v11 = vpack.c.bf16 %v463_v5, %v463_v5  ;;  %571 = vst.msk [vmem:[#allocation2 + $0x4c] sm:$0xf] %vm551_vm4, %v516_v4  ;;  %v2715_v16 = vsel %vm3395_vm5, %v2714_v7, %v289_v31  ;;  %v2825_v17 = vand.u32 2147483648, %v303_v58  ;;  %vm3408_vm6 = vcmp.lt.f32.partialorder %v2812_v1, 8388608.0  ;;  %v2564_v32 = vld [vmem:[#allocation2 + $0x10] sm:$0xff] }
  0x4b   : > { %v397_v21 = vmax.f32 %v2715_v16, -128.0  ;;  %v450_v14 = vmin.f32 %v396_v8, 127.0  ;;  %v2816_v23 = vand.u32 2147483647, %v2815_v9  ;;  %v2824_v25 = vand.u32 2147483647, %v2823_v20 }
  0x4c   : > { %572 = vst.msk [vmem:[#allocation2 + $0x50] sm:$0xf] %vm551_vm4, %v517_v11  ;;  %v290_v18 = vmul.f32 16.0, %v236_v13  ;;  %v291_v26 = vmul.f32 16.0, %v237_v15  ;;  %vm3414_vm7 = vcmp.lt.f32.partialorder %v2820_v12, 8388608.0  ;;  %v3418_v36 = vmul.f32 16.0, %v250_v24 }
  0x4d   : > { %v451_v27 = vmin.f32 %v397_v21, 127.0  ;;  %v504_v28 = vpack.c.bf16 %v450_v14, %v450_v14  ;;  %v2818_v29 = vor.u32 %v2817_v10, %v2816_v23  ;;  %v2826_v33 = vor.u32 %v2825_v17, %v2824_v25  ;;  %v252_v8 = vld [vmem:[%s3184_s27 + $0xc8] sm:$0xff]  ;;  %v253_v15 = vld [vmem:[%s3184_s27 + $0xd0] sm:$0xff] }
  0x4e   : > { %v2576_v31 = vld [vmem:[#allocation2 + $0x14] sm:$0xff]  ;;  %v2716_v34 = vand.u32 2147483647, %v290_v18  ;;  %v2718_v35 = vcvt.f32.s32 %v290_v18  ;;  %v2724_v40 = vand.u32 2147483647, %v291_v26  ;;  %v2726_v41 = vcvt.f32.s32 %v291_v26 }
  0x4f   : > { %v505_v38 = vpack.c.bf16 %v451_v27, %v451_v27  ;;  %559 = vst.msk [vmem:[#allocation2 + $0x1c] sm:$0xf] %vm551_vm4, %v504_v28  ;;  %v2819_v39 = vsel %vm3408_vm6, %v2818_v29, %v302_v57  ;;  %2263 = vmatmul.msk.bf16.gmra.mxu1 %vm701_vm8, %v2576_v31  ;;  %v2827_v42 = vsel %vm3414_vm7, %v2826_v33, %v303_v58  ;;  %v2721_v45 = vand.u32 2147483648, %v290_v18  ;;  %v238_v58 = vld [vmem:[%s3184_s27 + $0x58] sm:$0xff]  ;;  %v257_v4 = vld [vmem:[%s3184_s27 + $0xf0] sm:$0xff] }
  0x50   : > { %v410_v44 = vmax.f32 %v2819_v39, -128.0  ;;  %v2719_v19 = vcvt.s32.f32 %v2718_v35  ;;  %v411_v46 = vmax.f32 %v2827_v42, -128.0  ;;  %vm3428_vm9 = vcmp.lt.f32.partialorder %v2716_v34, 8388608.0 }
  0x51   : > { %560 = vst.msk [vmem:[#allocation2 + $0x20] sm:$0xf] %vm551_vm4, %v505_v38  ;;  %v2727_v48 = vcvt.s32.f32 %v2726_v41  ;;  %v2729_v49 = vand.u32 2147483648, %v291_v26  ;;  %2198 = vmatmul.msk.bf16.gmra.mxu0 %vm701_vm8, %v2564_v32  ;;  %v305_v52 = vmul.f32 16.0, %v251_v43  ;;  %v2828_v53 = vand.u32 2147483647, %v3418_v36 }
  0x52   : > { %v464_v50 = vmin.f32 %v410_v44, 127.0  ;;  %v2720_v51 = vand.u32 2147483647, %v2719_v19  ;;  %2204 = vmatmul.msk.bf16.gmra.mxu2 %vm701_vm8, %v2570_v37  ;;  %v465_v54 = vmin.f32 %v411_v46, 127.0  ;;  %vm3435_vm10 = vcmp.lt.f32.partialorder %v2724_v40, 8388608.0  ;;  %v2571_v19 = vld [vmem:[#allocation2 + $0x48] sm:$0xff] }
  0x53   : > { %v2728_v56 = vand.u32 2147483647, %v2727_v48  ;;  %v2830_v57 = vcvt.f32.s32 %v3418_v36  ;;  %v2833_v61 = vand.u32 2147483648, %v3418_v36  ;;  %v2836_v62 = vand.u32 2147483647, %v305_v52  ;;  %v2583_v63 = vld [vmem:[#allocation2 + $0x4c] sm:$0xff] }
  0x54   : > { %v518_v59 = vpack.c.bf16 %v464_v50, %v464_v50  ;;  %v2722_v60 = vor.u32 %v2721_v45, %v2720_v51  ;;  %v519_v0 = vpack.c.bf16 %v465_v54, %v465_v54  ;;  %v2838_v3 = vcvt.f32.s32 %v305_v52 }
  0x55   : > { %v2730_v1 = vor.u32 %v2729_v49, %v2728_v56  ;;  %v2831_v2 = vcvt.s32.f32 %v2830_v57  ;;  %vm3445_vm11 = vcmp.lt.f32.partialorder %v2828_v53, 8388608.0  ;;  %v2841_v6 = vand.u32 2147483648, %v305_v52  ;;  %v259_v57 = vld [vmem:[%s3184_s27 + $0x100] sm:$0xff] }
  0x56   : > { %573 = vst.msk [vmem:[#allocation2 + $0x54] sm:$0xf] %vm551_vm4, %v518_v59  ;;  %v2723_v5 = vsel %vm3428_vm9, %v2722_v60, %v290_v18  ;;  %v292_v7 = vmul.f32 16.0, %v238_v58  ;;  %v2839_v13 = vcvt.s32.f32 %v2838_v3  ;;  %vm3454_vm12 = vcmp.lt.f32.partialorder %v2836_v62, 8388608.0  ;;  %v2565_v41 = vld [vmem:[#allocation2 + $0x18] sm:$0xff] }
  0x57   : > { %574 = vst.msk [vmem:[#allocation2 + $0x58] sm:$0xf] %vm551_vm4, %v519_v0  ;;  %v2731_v9 = vsel %vm3435_vm10, %v2730_v1, %v291_v26  ;;  %v398_v10 = vmax.f32 %v2723_v5, -128.0  ;;  %v2832_v12 = vand.u32 2147483647, %v2831_v2  ;;  %v306_v23 = vmul.f32 16.0, %v252_v8 }
  0x58   : > { %v399_v11 = vmax.f32 %v2731_v9, -128.0  ;;  %v2732_v20 = vand.u32 2147483647, %v292_v7  ;;  %v2734_v17 = vcvt.f32.s32 %v292_v7  ;;  %2270 = vmatmul.msk.bf16.gmra.mxu3 %vm701_vm8, %v2583_v63  ;;  %v2840_v22 = vand.u32 2147483647, %v2839_v13  ;;  %v2577_v31 = vld [vmem:[#allocation2 + $0x1c] sm:$0xff] }
  0x59   : > { %v452_v21 = vmin.f32 %v398_v10, 127.0  ;;  %v2834_v14 = vor.u32 %v2833_v61, %v2832_v12  ;;  %v2737_v18 = vand.u32 2147483648, %v292_v7  ;;  %v307_v26 = vmul.f32 16.0, %v253_v15  ;;  %v254_v60 = vld [vmem:[%s3184_s27 + $0xd8] sm:$0xff]  ;;  %v255_v61 = vld [vmem:[%s3184_s27 + $0xe0] sm:$0xff] }
  0x5a   : > { %v453_v24 = vmin.f32 %v399_v11, 127.0  ;;  %v2735_v25 = vcvt.s32.f32 %v2734_v17  ;;  %v2842_v29 = vor.u32 %v2841_v6, %v2840_v22  ;;  %vm3462_vm13 = vcmp.lt.f32.partialorder %v2732_v20, 8388608.0  ;;  %v258_v6 = vld [vmem:[%s3184_s27 + $0xf8] sm:$0xff] }
  0x5b   : > { %v506_v27 = vpack.c.bf16 %v452_v21, %v452_v21  ;;  %v2835_v28 = vsel %vm3445_vm11, %v2834_v14, %v3418_v36  ;;  %v2846_v35 = vcvt.f32.s32 %v306_v23  ;;  %v2844_v38 = vand.u32 2147483647, %v306_v23 }
  0x5c   : > { %v507_v32 = vpack.c.bf16 %v453_v24, %v453_v24  ;;  %v412_v33 = vmax.f32 %v2835_v28, -128.0  ;;  %v2736_v34 = vand.u32 2147483647, %v2735_v25  ;;  %v2843_v37 = vsel %vm3454_vm12, %v2842_v29, %v305_v52 }
  0x5d   : > { %561 = vst.msk [vmem:[#allocation2 + $0x24] sm:$0xf] %vm551_vm4, %v506_v27  ;;  %v2849_v39 = vand.u32 2147483648, %v306_v23  ;;  %v2854_v40 = vcvt.f32.s32 %v307_v26  ;;  %v413_v36 = vmax.f32 %v2843_v37, -128.0  ;;  %v2847_v44 = vcvt.s32.f32 %v2846_v35 }
  0x5e   : > { %562 = vst.msk [vmem:[#allocation2 + $0x28] sm:$0xf] %vm551_vm4, %v507_v32  ;;  %v466_v43 = vmin.f32 %v412_v33, 127.0  ;;  %v2738_v42 = vor.u32 %v2737_v18, %v2736_v34  ;;  %v2852_v45 = vand.u32 2147483647, %v307_v26  ;;  %v2857_v47 = vand.u32 2147483648, %v307_v26 }
  0x5f   : > { %v2855_v46 = vcvt.s32.f32 %v2854_v40  ;;  %2264 = vmatmul.msk.bf16.gmra.mxu1 %vm701_vm8, %v2577_v31  ;;  %v467_v48 = vmin.f32 %v413_v36, 127.0  ;;  %v2848_v51 = vand.u32 2147483647, %v2847_v44  ;;  %vm3473_vm14 = vcmp.lt.f32.partialorder %v2844_v38, 8388608.0  ;;  %v2584_v1 = vld [vmem:[#allocation2 + $0x54] sm:$0xff] }
  0x60   : > { %v520_v49 = vpack.c.bf16 %v466_v43, %v466_v43  ;;  %v2739_v50 = vsel %vm3462_vm13, %v2738_v42, %v292_v7  ;;  %vm3479_vm15 = vcmp.lt.f32.partialorder %v2852_v45, 8388608.0  ;;  %v308_v63 = vmul.f32 16.0, %v254_v60  ;;  %v2572_v40 = vld [vmem:[#allocation2 + $0x50] sm:$0xff] }
  0x61   : > { %v400_v52 = vmax.f32 %v2739_v50, -128.0  ;;  %v2856_v54 = vand.u32 2147483647, %v2855_v46  ;;  %2199 = vmatmul.msk.bf16.gmra.mxu0 %vm701_vm8, %v2565_v41  ;;  %v521_v55 = vpack.c.bf16 %v467_v48, %v467_v48  ;;  %v2850_v56 = vor.u32 %v2849_v39, %v2848_v51  ;;  %v256_v50 = vld [vmem:[%s3184_s27 + $0xe8] sm:$0xff] }
  0x62   : > { %575 = vst.msk [vmem:[#allocation2 + $0x5c] sm:$0xf] %vm551_vm4, %v520_v49  ;;  %2205 = vmatmul.msk.bf16.gmra.mxu2 %vm701_vm8, %v2571_v19  ;;  %v309_v0 = vmul.f32 16.0, %v255_v61  ;;  %v2862_v8 = vcvt.f32.s32 %v308_v63  ;;  %v311_v10 = vmul.f32 16.0, %v257_v4  ;;  %v312_v13 = vmul.f32 16.0, %v258_v6 }
  0x63   : > { %v454_v58 = vmin.f32 %v400_v52, 127.0  ;;  %v2858_v59 = vor.u32 %v2857_v47, %v2856_v54  ;;  %576 = vst.msk [vmem:[#allocation2 + $0x60] sm:$0xf] %vm551_vm4, %v521_v55  ;;  %v2851_v62 = vsel %vm3473_vm14, %v2850_v56, %v306_v23  ;;  %v2865_v23 = vand.u32 2147483648, %v308_v63 }
  0x64   : > { %v414_v5 = vmax.f32 %v2851_v62, -128.0  ;;  %v2870_v9 = vcvt.f32.s32 %v309_v0  ;;  %v2863_v11 = vcvt.s32.f32 %v2862_v8  ;;  %v2886_v20 = vcvt.f32.s32 %v311_v10  ;;  %v2566_v35 = vld [vmem:[#allocation2 + $0x20] sm:$0xff] }
  0x65   : > { %v508_v2 = vpack.c.bf16 %v454_v58, %v454_v58  ;;  %v2859_v3 = vsel %vm3479_vm15, %v2858_v59, %v307_v26  ;;  %v2894_v21 = vcvt.f32.s32 %v312_v13  ;;  %v2860_v25 = vand.u32 2147483647, %v308_v63  ;;  %v2578_v27 = vld [vmem:[#allocation2 + $0x24] sm:$0xff] }
  0x66   : > { %v415_v7 = vmax.f32 %v2859_v3, -128.0  ;;  %v468_v12 = vmin.f32 %v414_v5, 127.0  ;;  %v2871_v16 = vcvt.s32.f32 %v2870_v9  ;;  %v2864_v22 = vand.u32 2147483647, %v2863_v11  ;;  %v260_v58 = vld [vmem:[%s3184_s27 + $0x108] sm:$0xff] }
  0x67   : > { %563 = vst.msk [vmem:[#allocation2 + $0x2c] sm:$0xf] %vm551_vm4, %v508_v2  ;;  %v2873_v18 = vand.u32 2147483648, %v309_v0  ;;  %v2887_v26 = vcvt.s32.f32 %v2886_v20  ;;  %v2868_v29 = vand.u32 2147483647, %v309_v0  ;;  %v2889_v30 = vand.u32 2147483648, %v311_v10 }
  0x68   : > { %v469_v15 = vmin.f32 %v415_v7, 127.0  ;;  %2271 = vmatmul.msk.bf16.gmra.mxu3 %vm701_vm8, %v2584_v1  ;;  %v522_v17 = vpack.c.bf16 %v468_v12, %v468_v12  ;;  %v2872_v24 = vand.u32 2147483647, %v2871_v16  ;;  %v2866_v28 = vor.u32 %v2865_v23, %v2864_v22 }
  0x69   : > { %v2895_v31 = vcvt.s32.f32 %v2894_v21  ;;  %vm2861_vm0 = vcmp.lt.f32.partialorder %v2860_v25, 8388608.0  ;;  %v2884_v33 = vand.u32 2147483647, %v311_v10  ;;  %v2888_v34 = vand.u32 2147483647, %v2887_v26  ;;  %v2573_v22 = vld [vmem:[#allocation2 + $0x58] sm:$0xff] }
  0x6a   : > { %v523_v14 = vpack.c.bf16 %v469_v15, %v469_v15  ;;  %577 = vst.msk [vmem:[#allocation2 + $0x64] sm:$0xf] %vm551_vm4, %v522_v17  ;;  %v2874_v32 = vor.u32 %v2873_v18, %v2872_v24  ;;  %v2867_v37 = vsel %vm2861_vm0, %v2866_v28, %v308_v63  ;;  %vm2869_vm1 = vcmp.lt.f32.partialorder %v2868_v29, 8388608.0  ;;  %v2585_v55 = vld [vmem:[#allocation2 + $0x5c] sm:$0xff] }
  0x6b   : > { %v2892_v38 = vand.u32 2147483647, %v312_v13  ;;  %v2897_v39 = vand.u32 2147483648, %v312_v13  ;;  %v416_v36 = vmax.f32 %v2867_v37, -128.0  ;;  %vm2885_vm2 = vcmp.lt.f32.partialorder %v2884_v33, 8388608.0 }
  0x6c   : > { %578 = vst.msk [vmem:[#allocation2 + $0x68] sm:$0xf] %vm551_vm4, %v523_v14  ;;  %v2875_v41 = vsel %vm2869_vm1, %v2874_v32, %v309_v0  ;;  %v2890_v43 = vor.u32 %v2889_v30, %v2888_v34  ;;  %v2896_v44 = vand.u32 2147483647, %v2895_v31  ;;  %v310_v54 = vmul.f32 16.0, %v256_v50  ;;  %v261_v34 = vld [vmem:[%s3184_s27 + $0x110] sm:$0xff] }
  0x6d   : > { %v417_v42 = vmax.f32 %v2875_v41, -128.0  ;;  %v470_v19 = vmin.f32 %v416_v36, 127.0  ;;  %vm2893_vm3 = vcmp.lt.f32.partialorder %v2892_v38, 8388608.0  ;;  %v313_v61 = vmul.f32 16.0, %v259_v57 }
  0x6e   : > { %v2891_v45 = vsel %vm2885_vm2, %v2890_v43, %v311_v10  ;;  %v2898_v47 = vor.u32 %v2897_v39, %v2896_v44  ;;  %v2878_v60 = vcvt.f32.s32 %v310_v54  ;;  %v314_v62 = vmul.f32 16.0, %v260_v58  ;;  %v2579_v9 = vld [vmem:[#allocation2 + $0x2c] sm:$0xff] }
  0x6f   : > { %2265 = vmatmul.msk.bf16.gmra.mxu1 %vm701_vm8, %v2578_v27  ;;  %v471_v46 = vmin.f32 %v417_v42, 127.0  ;;  %v419_v48 = vmax.f32 %v2891_v45, -128.0  ;;  %v524_v49 = vpack.c.bf16 %v470_v19, %v470_v19  ;;  %v2902_v1 = vcvt.f32.s32 %v313_v61  ;;  %v2567_v20 = vld [vmem:[#allocation2 + $0x28] sm:$0xff]  ;;  %v2580_v42 = vld [vmem:[#allocation2 + $0x34] sm:$0xff] }
  0x70   : > { %v2899_v52 = vsel %vm2893_vm3, %v2898_v47, %v312_v13  ;;  %v2879_v0 = vcvt.s32.f32 %v2878_v60  ;;  %v2910_v2 = vcvt.f32.s32 %v314_v62  ;;  %v2881_v4 = vand.u32 2147483648, %v310_v54 }
  0x71   : > { %2200 = vmatmul.msk.bf16.gmra.mxu0 %vm701_vm8, %v2566_v35  ;;  %v525_v51 = vpack.c.bf16 %v471_v46, %v471_v46  ;;  %v473_v53 = vmin.f32 %v419_v48, 127.0  ;;  %579 = vst.msk [vmem:[#allocation2 + $0x6c] sm:$0xf] %vm551_vm4, %v524_v49  ;;  %v420_v56 = vmax.f32 %v2899_v52, -128.0  ;;  %v2903_v6 = vcvt.s32.f32 %v2902_v1  ;;  %v262_v35 = vld [vmem:[%s3184_s27 + $0x118] sm:$0xff] }
  0x72   : > { %2206 = vmatmul.msk.bf16.gmra.mxu2 %vm701_vm8, %v2572_v40  ;;  %v2880_v5 = vand.u32 2147483647, %v2879_v0  ;;  %v2911_v7 = vcvt.s32.f32 %v2910_v2  ;;  %v2876_v8 = vand.u32 2147483647, %v310_v54  ;;  %v2905_v13 = vand.u32 2147483648, %v313_v61 }
  0x73   : > { %580 = vst.msk [vmem:[#allocation2 + $0x70] sm:$0xf] %vm551_vm4, %v525_v51  ;;  %v527_v59 = vpack.c.bf16 %v473_v53, %v473_v53  ;;  %v474_v63 = vmin.f32 %v420_v56, 127.0  ;;  %v2904_v12 = vand.u32 2147483647, %v2903_v6  ;;  %v2913_v14 = vand.u32 2147483648, %v314_v62 }
  0x74   : > { %v2882_v10 = vor.u32 %v2881_v4, %v2880_v5  ;;  %v2912_v15 = vand.u32 2147483647, %v2911_v7  ;;  %vm2877_vm5 = vcmp.lt.f32.partialorder %v2876_v8, 8388608.0  ;;  %v2900_v11 = vand.u32 2147483647, %v313_v61  ;;  %v2586_v31 = vld [vmem:[#allocation2 + $0x64] sm:$0xff] }
  0x75   : > { %582 = vst.msk [vmem:[#allocation2 + $0x78] sm:$0xf] %vm551_vm4, %v527_v59  ;;  %v528_v3 = vpack.c.bf16 %v474_v63, %v474_v63  ;;  %v2908_v16 = vand.u32 2147483647, %v314_v62  ;;  %v2906_v21 = vor.u32 %v2905_v13, %v2904_v12  ;;  %v315_v37 = vmul.f32 16.0, %v261_v34  ;;  %v2588_v51 = vld [vmem:[#allocation2 + $0x18] sm:$0xff] }
  0x76   : > { %v2883_v17 = vsel %vm2877_vm5, %v2882_v10, %v310_v54  ;;  %vm2901_vm6 = vcmp.lt.f32.partialorder %v2900_v11, 8388608.0  ;;  %v2914_v25 = vor.u32 %v2913_v14, %v2912_v15  ;;  %v316_v38 = vmul.f32 16.0, %v262_v35  ;;  %v2601_v59 = vld [vmem:[#allocation2 + $0x60] sm:$0xff] }
  0x77   : > { %583 = vst.msk [vmem:[#allocation2 + $0x7c] sm:$0xf] %vm551_vm4, %v528_v3  ;;  %v418_v23 = vmax.f32 %v2883_v17, -128.0  ;;  %vm2909_vm7 = vcmp.lt.f32.partialorder %v2908_v16, 8388608.0  ;;  %v2907_v24 = vsel %vm2901_vm6, %v2906_v21, %v313_v61  ;;  %v2918_v40 = vcvt.f32.s32 %v315_v37  ;;  %v263_v61 = vld [vmem:[%s3184_s27 + $0x120] sm:$0xff] }
  0x78   : > { %2272 = vmatmul.msk.bf16.gmra.mxu3 %vm701_vm8, %v2585_v55  ;;  %v421_v26 = vmax.f32 %v2907_v24, -128.0  ;;  %v2915_v27 = vsel %vm2909_vm7, %v2914_v25, %v314_v62  ;;  %v2926_v41 = vcvt.f32.s32 %v316_v38  ;;  %v2921_v19 = vand.u32 2147483648, %v315_v37  ;;  %v264_v62 = vld [vmem:[%s3184_s27 + $0x128] sm:$0xff] }
  0x79   : > { %v472_v18 = vmin.f32 %v418_v23, 127.0  ;;  %v422_v29 = vmax.f32 %v2915_v27, -128.0  ;;  %v2919_v36 = vcvt.s32.f32 %v2918_v40  ;;  %v2916_v46 = vand.u32 2147483647, %v315_v37  ;;  %v2602_v25 = vld [vmem:[#allocation2 + $0x68] sm:$0xff]  ;;  %v265_v27 = vld [vmem:[%s3184_s27 + $0x130] sm:$0xff] }
  0x7a   : > { %v475_v30 = vmin.f32 %v421_v26, 127.0  ;;  %v2927_v43 = vcvt.s32.f32 %v2926_v41  ;;  %v2924_v47 = vand.u32 2147483647, %v316_v38  ;;  %v2929_v48 = vand.u32 2147483648, %v316_v38  ;;  %v2614_v49 = vld [vmem:[#allocation2 + $0x6c] sm:$0xff] }
  0x7b   : > { %v526_v28 = vpack.c.bf16 %v472_v18, %v472_v18  ;;  %v476_v32 = vmin.f32 %v422_v29, 127.0  ;;  %v2920_v44 = vand.u32 2147483647, %v2919_v36  ;;  %vm2917_vm9 = vcmp.lt.f32.partialorder %v2916_v46, 8388608.0 }
  0x7c   : > { %v529_v33 = vpack.c.bf16 %v475_v30, %v475_v30  ;;  %v2928_v45 = vand.u32 2147483647, %v2927_v43  ;;  %vm2925_vm10 = vcmp.lt.f32.partialorder %v2924_v47, 8388608.0  ;;  %v317_v0 = vmul.f32 16.0, %v263_v61 }
  0x7d   : > { %581 = vst.msk [vmem:[#allocation2 + $0x74] sm:$0xf] %vm551_vm4, %v526_v28  ;;  %v530_v39 = vpack.c.bf16 %v476_v32, %v476_v32  ;;  %v2922_v50 = vor.u32 %v2921_v19, %v2920_v44  ;;  %v318_v1 = vmul.f32 16.0, %v264_v62  ;;  %v266_v28 = vld [vmem:[%s3184_s27 + $0x138] sm:$0xff]  ;;  %v319_v29 = vmul.f32 16.0, %v265_v27  ;;  %v2590_v19 = vld [vmem:[#allocation2 + $0x28] sm:$0xff] }
  0x7e   : > { %584 = vst.msk [vmem:[#allocation2 + $0x80] sm:$0xf] %vm551_vm4, %v529_v33  ;;  %v2930_v52 = vor.u32 %v2929_v48, %v2928_v45  ;;  %v2934_v2 = vcvt.f32.s32 %v317_v0  ;;  %v2627_v6 = vld [vmem:[#allocation2 + $0x78] sm:$0xff]  ;;  %v2937_v8 = vand.u32 2147483648, %v317_v0  ;;  %v2932_v12 = vand.u32 2147483647, %v317_v0 }
  0x7f   : > { %2266 = vmatmul.msk.bf16.gmra.mxu1 %vm701_vm8, %v2579_v9  ;;  %585 = vst.msk [vmem:[#allocation2 + $0x84] sm:$0xf] %vm551_vm4, %v530_v39  ;;  %v2923_v53 = vsel %vm2917_vm9, %v2922_v50, %v315_v37  ;;  %v2942_v3 = vcvt.f32.s32 %v318_v1  ;;  %v2945_v10 = vand.u32 2147483648, %v318_v1  ;;  %v2940_v13 = vand.u32 2147483647, %v318_v1 }
  0x80   : > { %v2931_v54 = vsel %vm2925_vm10, %v2930_v52, %v316_v38  ;;  %v423_v55 = vmax.f32 %v2923_v53, -128.0  ;;  %v2935_v5 = vcvt.s32.f32 %v2934_v2  ;;  %vm2933_vm11 = vcmp.lt.f32.partialorder %v2932_v12, 8388608.0  ;;  %v3537_v45 = vld [vmem:[%s3799_s2] ss:$0 sm:$0xff] }
  0x81   : > { %2201 = vmatmul.msk.bf16.gmra.mxu0 %vm701_vm8, %v2567_v20  ;;  %v424_v56 = vmax.f32 %v2931_v54, -128.0  ;;  %v2943_v4 = vcvt.s32.f32 %v2942_v3  ;;  %v2589_v20 = vld [vmem:[#allocation2 + $0x20] sm:$0xff]  ;;  %vm2941_vm12 = vcmp.lt.f32.partialorder %v2940_v13, 8388608.0  ;;  %v320_v30 = vmul.f32 16.0, %v266_v28 }
  0x82   : > { %2207 = vmatmul.msk.bf16.gmra.mxu2 %vm701_vm8, %v2573_v22  ;;  %v477_v57 = vmin.f32 %v423_v55, 127.0  ;;  %v2936_v7 = vand.u32 2147483647, %v2935_v5  ;;  %v2953_v39 = vand.u32 2147483648, %v319_v29  ;;  %v2948_v40 = vand.u32 2147483647, %v319_v29 }
  0x83   : > { %v478_v58 = vmin.f32 %v424_v56, 127.0  ;;  %v2944_v9 = vand.u32 2147483647, %v2943_v4  ;;  %v2958_v32 = vcvt.f32.s32 %v320_v30  ;;  %v2956_v41 = vand.u32 2147483647, %v320_v30 }
  0x84   : > { %v531_v60 = vpack.c.bf16 %v477_v57, %v477_v57  ;;  %v2615_v15 = vld [vmem:[#allocation2 + $0x74] sm:$0xff]  ;;  %v2938_v11 = vor.u32 %v2937_v8, %v2936_v7  ;;  %v2961_v44 = vand.u32 2147483648, %v320_v30  ;;  %vm2949_vm13 = vcmp.lt.f32.partialorder %v2948_v40, 8388608.0 }
  0x85   : > { %v532_v63 = vpack.c.bf16 %v478_v58, %v478_v58  ;;  %v2946_v16 = vor.u32 %v2945_v10, %v2944_v9  ;;  %v2959_v34 = vcvt.s32.f32 %v2958_v32  ;;  %v2616_v43 = vld [vmem:[#allocation2 + $0x7c] sm:$0xff]  ;;  %vm2957_vm14 = vcmp.lt.f32.partialorder %v2956_v41, 8388608.0  ;;  %v2603_v54 = vld [vmem:[#allocation2 + $0x70] sm:$0xff] }
  0x86   : > { %586 = vst.msk [vmem:[#allocation2 + $0x88] sm:$0xf] %vm551_vm4, %v531_v60  ;;  %v2939_v17 = vsel %vm2933_vm11, %v2938_v11, %v317_v0  ;;  %v2628_v37 = vld [vmem:[#allocation2 + $0x80] sm:$0xff] }
  0x87   : > { %587 = vst.msk [vmem:[#allocation2 + $0x8c] sm:$0xf] %vm551_vm4, %v532_v63  ;;  %v2947_v21 = vsel %vm2941_vm12, %v2946_v16, %v318_v1  ;;  %v425_v14 = vmax.f32 %v2939_v17, -128.0  ;;  %v2960_v36 = vand.u32 2147483647, %v2959_v34  ;;  %v267_v58 = vld [vmem:[%s3184_s27 + $0x140] sm:$0xff] }
  0x88   : > { %2273 = vmatmul.msk.bf16.gmra.mxu3 %vm701_vm8, %v2586_v31  ;;  %v426_v22 = vmax.f32 %v2947_v21, -128.0  ;;  %v2950_v31 = vcvt.f32.s32 %v319_v29  ;;  %v321_v60 = vmul.f32 16.0, %v267_v58 }
  0x89   : > { %v479_v23 = vmin.f32 %v425_v14, 127.0  ;;  %v2962_v47 = vor.u32 %v2961_v44, %v2960_v36 }
  0x8a   : > { %v480_v24 = vmin.f32 %v426_v22, 127.0  ;;  %v2951_v33 = vcvt.s32.f32 %v2950_v31  ;;  %v2966_v2 = vcvt.f32.s32 %v321_v60  ;;  %v2969_v13 = vand.u32 2147483648, %v321_v60 }
  0x8b   : > { %v533_v18 = vpack.c.bf16 %v479_v23, %v479_v23  ;;  %v2963_v50 = vsel %vm2957_vm14, %v2962_v47, %v320_v30 }
  0x8c   : > { %v534_v26 = vpack.c.bf16 %v480_v24, %v480_v24  ;;  %v2952_v38 = vand.u32 2147483647, %v2951_v33  ;;  %v2591_v24 = vld [vmem:[#allocation2 + $0x30] sm:$0xff]  ;;  %v2604_v33 = vld [vmem:[#allocation2 + $0x78] sm:$0xff] }
  0x8d   : > { %588 = vst.msk [vmem:[#allocation2 + $0x90] sm:$0xf] %vm551_vm4, %v533_v18 }
  0x8e   : > { %589 = vst.msk [vmem:[#allocation2 + $0x94] sm:$0xf] %vm551_vm4, %v534_v26  ;;  %v2629_v9 = vld [vmem:[#allocation2 + $0x88] sm:$0xff] }
  0x8f   : > { %2267 = vmatmul.msk.bf16.gmra.mxu1 %vm701_vm8, %v2580_v42  ;;  %v2954_v42 = vor.u32 %v2953_v39, %v2952_v38  ;;  %v270_v38 = vld [vmem:[%s3184_s27 + $0x158] sm:$0xff] }
  0x90   : > { %v324_v41 = vmul.f32 16.0, %v270_v38 }
  0x91   : > { %2458 = vmatmul.msk.bf16.vlgmr.msrb.gmra.mxu0 %vm701_vm8, %v2614_v49  ;;  %v2955_v46 = vsel %vm2949_vm13, %v2954_v42, %v319_v29 }
  0x92   : > { %2328 = vmatmul.msk.bf16.vlgmr.msrb.gmra.mxu2 %vm701_vm8, %v2588_v51  ;;  %v427_v48 = vmax.f32 %v2955_v46, -128.0  ;;  %v428_v51 = vmax.f32 %v2963_v50, -128.0  ;;  %v2990_v44 = vcvt.f32.s32 %v324_v41 }
  0x94   : > { %v481_v52 = vmin.f32 %v427_v48, 127.0  ;;  %v482_v56 = vmin.f32 %v428_v51, 127.0  ;;  %v2991_v48 = vcvt.s32.f32 %v2990_v44 }
  0x96   : > { %v535_v57 = vpack.c.bf16 %v481_v52, %v481_v52  ;;  %v536_v0 = vpack.c.bf16 %v482_v56, %v482_v56  ;;  %v2988_v56 = vand.u32 2147483647, %v324_v41 }
  0x98   : > { %2392 = vmatmul.msk.bf16.vlgmr.msrb.gmra.mxu3 %vm701_vm8, %v2601_v59  ;;  %v268_v59 = vld [vmem:[%s3184_s27 + $0x148] sm:$0xff]  ;;  %590 = vst.msk [vmem:[#allocation2 + $0x98] sm:$0xf] %vm551_vm4, %v535_v57  ;;  %v2992_v57 = vand.u32 2147483647, %v2991_v48  ;;  %vm2989_vm2 = vcmp.lt.f32.partialorder %v2988_v56, 8388608.0 }
  0x99   : > { %v322_v61 = vmul.f32 16.0, %v268_v59  ;;  %591 = vst.msk [vmem:[#allocation2 + $0x9c] sm:$0xf] %vm551_vm4, %v536_v0  ;;  %v2592_v0 = vld [vmem:[#allocation2 + $0x38] sm:$0xff] }
  0x9b   : > { %v2974_v3 = vcvt.f32.s32 %v322_v61  ;;  %v2972_v11 = vand.u32 2147483647, %v322_v61  ;;  %v2977_v21 = vand.u32 2147483648, %v322_v61 }
  0x9d   : > { %v2975_v7 = vcvt.s32.f32 %v2974_v3  ;;  %vm2973_vm0 = vcmp.lt.f32.partialorder %v2972_v11, 8388608.0  ;;  %v2605_v11 = vld [vmem:[#allocation2 + $0x80] sm:$0xff] }
  0x9f   : > { %2524 = vmatmul.msk.bf16.vlgmr.msrb.gmra.mxu1 %vm701_vm8, %v2627_v6  ;;  %v2967_v6 = vcvt.s32.f32 %v2966_v2  ;;  %v2976_v16 = vand.u32 2147483647, %v2975_v7 }
  0xa1   : > { %2459 = vmatmul.msk.bf16.gmra.mxu0 %vm701_vm8, %v2615_v15  ;;  %v2968_v12 = vand.u32 2147483647, %v2967_v6  ;;  %v2964_v15 = vand.u32 2147483647, %v321_v60  ;;  %v2978_v26 = vor.u32 %v2977_v21, %v2976_v16  ;;  %v272_v21 = vld [vmem:[%s3184_s27 + $0x168] sm:$0xff] }
  0xa2   : > { %2329 = vmatmul.msk.bf16.gmra.mxu2 %vm701_vm8, %v2589_v20  ;;  %v2617_v20 = vld [vmem:[#allocation2 + $0x84] sm:$0xff] }
  0xa3   : > { %v2970_v17 = vor.u32 %v2969_v13, %v2968_v12  ;;  %vm2965_vm15 = vcmp.lt.f32.partialorder %v2964_v15, 8388608.0  ;;  %v2979_v29 = vsel %vm2973_vm0, %v2978_v26, %v322_v61 }
  0xa4   : > { %v430_v31 = vmax.f32 %v2979_v29, -128.0 }
  0xa5   : > { %v2971_v18 = vsel %vm2965_vm15, %v2970_v17, %v321_v60  ;;  %v2618_v60 = vld [vmem:[#allocation2 + $0x8c] sm:$0xff]  ;;  %v271_v17 = vld [vmem:[%s3184_s27 + $0x160] sm:$0xff] }
  0xa6   : > { %v429_v27 = vmax.f32 %v2971_v18, -128.0  ;;  %v484_v34 = vmin.f32 %v430_v31, 127.0 }
  0xa8   : > { %2393 = vmatmul.msk.bf16.gmra.mxu3 %vm701_vm8, %v2602_v25  ;;  %v751_v35 = vpop.f32.mrf.mxu0  ;;  %v483_v32 = vmin.f32 %v429_v27, 127.0 }
  0xa9   : > { %v811_v62 = vadd.f32 %v3537_v45, %v751_v35 }
  0xaa   : > { %v537_v35 = vpack.c.bf16 %v483_v32, %v483_v32 }
  0xac   : > { %592 = vst.msk [vmem:[#allocation2 + $0xa0] sm:$0xf] %vm551_vm4, %v537_v35 }
  0xaf   : > { %2525 = vmatmul.msk.bf16.gmra.mxu1 %vm701_vm8, %v2628_v37  ;;  %v269_v37 = vld [vmem:[%s3184_s27 + $0x150] sm:$0xff] }
  0xb0   : > { %v753_v55 = vpop.f32.mrf.mxu0  ;;  %v323_v40 = vmul.f32 16.0, %v269_v37 }
  0xb1   : > { %2460 = vmatmul.msk.bf16.gmra.mxu0 %vm701_vm8, %v2616_v43  ;;  %v781_v49 = vpop.f32.mrf.mxu2  ;;  %v812_v14 = vadd.f32 %v3537_v45, %v753_v55  ;;  %v538_v43 = vpack.c.bf16 %v484_v34, %v484_v34  ;;  %v2631_v34 = vld [vmem:[#allocation2 + $0x98] sm:$0xff] }
  0xb2   : > { %2330 = vmatmul.msk.bf16.gmra.mxu2 %vm701_vm8, %v2590_v19  ;;  %v823_v53 = vadd.f32 %v3537_v45, %v781_v49  ;;  %v2982_v42 = vcvt.f32.s32 %v323_v40  ;;  %v2630_v49 = vld [vmem:[#allocation2 + $0x90] sm:$0xff]  ;;  %v2985_v52 = vand.u32 2147483648, %v323_v40  ;;  %v2980_v55 = vand.u32 2147483647, %v323_v40 }
  0xb3   : > { %593 = vst.msk [vmem:[#allocation2 + $0xa4] sm:$0xf] %vm551_vm4, %v538_v43 }
  0xb4   : > { %v2983_v47 = vcvt.s32.f32 %v2982_v42  ;;  %vm2981_vm1 = vcmp.lt.f32.partialorder %v2980_v55, 8388608.0 }
  0xb6   : > { %v2984_v51 = vand.u32 2147483647, %v2983_v47 }
  0xb7   : > { %v1010_v63 = vpop.f32.mrf.mxu3 }
  0xb8   : > { %v3546_v1 = vadd.f32 %v1010_v63, %v823_v53  ;;  %2394 = vmatmul.msk.bf16.gmra.mxu3 %vm701_vm8, %v2603_v54  ;;  %v2986_v61 = vor.u32 %v2985_v52, %v2984_v51 }
  0xb9   : > { %v980_v5 = vpop.f32.mrf.mxu1  ;;  %v783_v4 = vpop.f32.mrf.mxu2 }
  0xba   : > { %v3550_v8 = vadd.f32 %v980_v5, %v811_v62  ;;  %v824_v10 = vadd.f32 %v3537_v45, %v783_v4  ;;  %v2993_v62 = vand.u32 2147483648, %v324_v41  ;;  %v2987_v2 = vsel %vm2981_vm1, %v2986_v61, %v323_v40 }
  0xbb   : > { %v431_v4 = vmax.f32 %v2987_v2, -128.0 }
  0xbc   : > { %v2994_v3 = vor.u32 %v2993_v62, %v2992_v57 }
  0xbe   : > { %v756_v23 = vpop.f32.mrf.mxu0  ;;  %v2995_v7 = vsel %vm2989_vm2, %v2994_v3, %v324_v41  ;;  %v273_v3 = vld [vmem:[%s3184_s27 + $0x170] sm:$0xff] }
  0xbf   : > { %v1012_v22 = vpop.f32.mrf.mxu3  ;;  %2526 = vmatmul.msk.bf16.gmra.mxu1 %vm701_vm8, %v2629_v9  ;;  %v813_v46 = vadd.f32 %v3537_v45, %v756_v23  ;;  %v432_v9 = vmax.f32 %v2995_v7, -128.0  ;;  %v325_v23 = vmul.f32 16.0, %v271_v17  ;;  %v327_v7 = vmul.f32 16.0, %v273_v3 }
  0xc0   : > { %v3555_v25 = vadd.f32 %v1012_v22, %v824_v10  ;;  %v485_v10 = vmin.f32 %v431_v4, 127.0 }
  0xc1   : > { %v982_v28 = vpop.f32.mrf.mxu1  ;;  %2461 = vmatmul.msk.bf16.gmra.mxu0 %vm701_vm8, %v2617_v20  ;;  %v486_v16 = vmin.f32 %v432_v9, 127.0  ;;  %v2998_v27 = vcvt.f32.s32 %v325_v23  ;;  %v3001_v38 = vand.u32 2147483648, %v325_v23  ;;  %v2996_v41 = vand.u32 2147483647, %v325_v23 }
  0xc2   : > { %v3558_v30 = vadd.f32 %v982_v28, %v812_v14  ;;  %2331 = vmatmul.msk.bf16.gmra.mxu2 %vm701_vm8, %v2591_v24  ;;  %v539_v20 = vpack.c.bf16 %v485_v10, %v485_v10  ;;  %v326_v24 = vmul.f32 16.0, %v272_v21 }
  0xc3   : > { %v540_v26 = vpack.c.bf16 %v486_v16, %v486_v16  ;;  %v2999_v32 = vcvt.s32.f32 %v2998_v27  ;;  %vm2997_vm3 = vcmp.lt.f32.partialorder %v2996_v41, 8388608.0 }
  0xc4   : > { %594 = vst.msk [vmem:[#allocation2 + $0xa8] sm:$0xf] %vm551_vm4, %v539_v20  ;;  %v3006_v28 = vcvt.f32.s32 %v326_v24  ;;  %v3009_v47 = vand.u32 2147483648, %v326_v24 }
  0xc5   : > { %v786_v39 = vpop.f32.mrf.mxu2  ;;  %595 = vst.msk [vmem:[#allocation2 + $0xac] sm:$0xf] %vm551_vm4, %v540_v26  ;;  %v3000_v37 = vand.u32 2147483647, %v2999_v32 }
  0xc6   : > { %v758_v36 = vpop.f32.mrf.mxu0  ;;  %v825_v19 = vadd.f32 %v3537_v45, %v786_v39 }
  0xc7   : > { %v814_v6 = vadd.f32 %v3537_v45, %v758_v36  ;;  %v3004_v36 = vand.u32 2147483647, %v326_v24 }
  0xc8   : > { %2395 = vmatmul.msk.bf16.gmra.mxu3 %vm701_vm8, %v2604_v33  ;;  %v3007_v33 = vcvt.s32.f32 %v3006_v28  ;;  %v3012_v28 = vand.u32 2147483647, %v327_v7 }
  0xc9   : > { %vm3005_vm5 = vcmp.lt.f32.partialorder %v3004_v36, 8388608.0 }
  0xca   : > { %v3008_v43 = vand.u32 2147483647, %v3007_v33  ;;  %vm3013_vm6 = vcmp.lt.f32.partialorder %v3012_v28, 8388608.0 }
  0xcb   : > { %v1015_v50 = vpop.f32.mrf.mxu3 }
  0xcc   : > { %v985_v53 = vpop.f32.mrf.mxu1  ;;  %v3568_v54 = vadd.f32 %v1015_v50, %v825_v19  ;;  %v2619_v19 = vld [vmem:[#allocation2 + $0x94] sm:$0xff]  ;;  %v3010_v51 = vor.u32 %v3009_v47, %v3008_v43 }
  0xcd   : > { %v3570_v58 = vadd.f32 %v985_v53, %v813_v46  ;;  %v788_v59 = vpop.f32.mrf.mxu2  ;;  %v3002_v46 = vor.u32 %v3001_v38, %v3000_v37 }
  0xce   : > { %v761_v63 = vpop.f32.mrf.mxu0  ;;  %v826_v5 = vadd.f32 %v3537_v45, %v788_v59  ;;  %v3011_v56 = vsel %vm3005_vm5, %v3010_v51, %v326_v24 }
  0xcf   : > { %2527 = vmatmul.msk.bf16.gmra.mxu1 %vm701_vm8, %v2630_v49  ;;  %v815_v31 = vadd.f32 %v3537_v45, %v761_v63  ;;  %v2593_v49 = vld [vmem:[#allocation2 + $0x40] sm:$0xff]  ;;  %v3003_v50 = vsel %vm2997_vm3, %v3002_v46, %v325_v23  ;;  %v434_v57 = vmax.f32 %v3011_v56, -128.0  ;;  %v2606_v63 = vld [vmem:[#allocation2 + $0x88] sm:$0xff] }
  0xd0   : > { %v433_v53 = vmax.f32 %v3003_v50, -128.0  ;;  %v275_v56 = vld [vmem:[%s3184_s27 + $0x180] sm:$0xff] }
  0xd1   : > { %2462 = vmatmul.msk.bf16.gmra.mxu0 %vm701_vm8, %v2618_v60 }
  0xd2   : > { %2332 = vmatmul.msk.bf16.gmra.mxu2 %vm701_vm8, %v2592_v0  ;;  %v487_v59 = vmin.f32 %v433_v53, 127.0  ;;  %v488_v0 = vmin.f32 %v434_v57, 127.0  ;;  %v276_v57 = vld [vmem:[%s3184_s27 + $0x188] sm:$0xff] }
  0xd3   : > { %v1017_v12 = vpop.f32.mrf.mxu3 }
  0xd4   : > { %v987_v13 = vpop.f32.mrf.mxu1  ;;  %v3577_v15 = vadd.f32 %v1017_v12, %v826_v5  ;;  %v541_v2 = vpack.c.bf16 %v487_v59, %v487_v59  ;;  %v274_v5 = vld [vmem:[%s3184_s27 + $0x178] sm:$0xff]  ;;  %v542_v12 = vpack.c.bf16 %v488_v0, %v488_v0 }
  0xd5   : > { %v3581_v14 = vadd.f32 %v987_v13, %v814_v6  ;;  %v791_v22 = vpop.f32.mrf.mxu2  ;;  %v328_v9 = vmul.f32 16.0, %v274_v5  ;;  %v3014_v13 = vcvt.f32.s32 %v327_v7 }
  0xd6   : > { %v763_v18 = vpop.f32.mrf.mxu0  ;;  %v827_v29 = vadd.f32 %v3537_v45, %v791_v22  ;;  %596 = vst.msk [vmem:[#allocation2 + $0xb0] sm:$0xf] %vm551_vm4, %v541_v2  ;;  %v2632_v22 = vld [vmem:[#allocation2 + $0xa0] sm:$0xff] }
  0xd7   : > { %v816_v55 = vadd.f32 %v3537_v45, %v763_v18  ;;  %597 = vst.msk [vmem:[#allocation2 + $0xb4] sm:$0xf] %vm551_vm4, %v542_v12  ;;  %v3015_v17 = vcvt.s32.f32 %v3014_v13  ;;  %v3017_v18 = vand.u32 2147483648, %v327_v7  ;;  %v3025_v37 = vand.u32 2147483648, %v328_v9  ;;  %v2633_v12 = vld [vmem:[#allocation2 + $0xa8] sm:$0xff] }
  0xd8   : > { %2396 = vmatmul.msk.bf16.gmra.mxu3 %vm701_vm8, %v2605_v11  ;;  %v3022_v11 = vcvt.f32.s32 %v328_v9 }
  0xd9   : > { %v3016_v24 = vand.u32 2147483647, %v3015_v17 }
  0xda   : > { %v3023_v21 = vcvt.s32.f32 %v3022_v11 }
  0xdb   : > { %v1020_v35 = vpop.f32.mrf.mxu3 }
  0xdc   : > { %v990_v39 = vpop.f32.mrf.mxu1  ;;  %v3588_v40 = vadd.f32 %v1020_v35, %v827_v29  ;;  %v3020_v29 = vand.u32 2147483647, %v328_v9  ;;  %v3018_v35 = vor.u32 %v3017_v18, %v3016_v24 }
  0xdd   : > { %v3590_v42 = vadd.f32 %v990_v39, %v815_v31  ;;  %v793_v44 = vpop.f32.mrf.mxu2  ;;  %v3024_v31 = vand.u32 2147483647, %v3023_v21  ;;  %v2594_v39 = vld [vmem:[#allocation2 + $0x48] sm:$0xff] }
  0xde   : > { %v766_v48 = vpop.f32.mrf.mxu0  ;;  %v828_v52 = vadd.f32 %v3537_v45, %v793_v44  ;;  %vm3021_vm7 = vcmp.lt.f32.partialorder %v3020_v29, 8388608.0  ;;  %v3019_v41 = vsel %vm3013_vm6, %v3018_v35, %v327_v7 }
  0xdf   : > { %2528 = vmatmul.msk.bf16.gmra.mxu1 %vm701_vm8, %v2631_v34  ;;  %v817_v20 = vadd.f32 %v3537_v45, %v766_v48  ;;  %v2620_v34 = vld [vmem:[#allocation2 + $0x9c] sm:$0xff]  ;;  %v3026_v36 = vor.u32 %v3025_v37, %v3024_v31  ;;  %v435_v44 = vmax.f32 %v3019_v41, -128.0 }
  0xe1   : > { %2463 = vmatmul.msk.bf16.gmra.mxu0 %vm701_vm8, %v2619_v19  ;;  %v3027_v46 = vsel %vm3021_vm7, %v3026_v36, %v328_v9  ;;  %v489_v48 = vmin.f32 %v435_v44, 127.0 }
  0xe2   : > { %2333 = vmatmul.msk.bf16.gmra.mxu2 %vm701_vm8, %v2593_v49  ;;  %v436_v47 = vmax.f32 %v3027_v46, -128.0 }
  0xe3   : > { %v1022_v60 = vpop.f32.mrf.mxu3 }
  0xe4   : > { %v992_v61 = vpop.f32.mrf.mxu1  ;;  %v3597_v62 = vadd.f32 %v1022_v60, %v828_v52  ;;  %v2607_v52 = vld [vmem:[#allocation2 + $0x90] sm:$0xff]  ;;  %v490_v53 = vmin.f32 %v436_v47, 127.0  ;;  %v2608_v47 = vld [vmem:[#allocation2 + $0x98] sm:$0xff] }
  0xe5   : > { %v3601_v4 = vadd.f32 %v992_v61, %v816_v55  ;;  %v796_v6 = vpop.f32.mrf.mxu2  ;;  %v543_v55 = vpack.c.bf16 %v489_v48, %v489_v48  ;;  %v329_v61 = vmul.f32 16.0, %v275_v56 }
  0xe6   : > { %v768_v10 = vpop.f32.mrf.mxu0  ;;  %v829_v16 = vadd.f32 %v3537_v45, %v796_v6  ;;  %v544_v2 = vpack.c.bf16 %v490_v53, %v490_v53 }
  0xe7   : > { %v818_v19 = vadd.f32 %v3537_v45, %v768_v10  ;;  %598 = vst.msk [vmem:[#allocation2 + $0xb8] sm:$0xf] %vm551_vm4, %v543_v55  ;;  %v3030_v3 = vcvt.f32.s32 %v329_v61  ;;  %v3028_v21 = vand.u32 2147483647, %v329_v61 }
  0xe8   : > { %2397 = vmatmul.msk.bf16.gmra.mxu3 %vm701_vm8, %v2606_v63  ;;  %v330_v63 = vmul.f32 16.0, %v276_v57  ;;  %599 = vst.msk [vmem:[#allocation2 + $0xbc] sm:$0xf] %vm551_vm4, %v544_v2 }
  0xe9   : > { %v3031_v9 = vcvt.s32.f32 %v3030_v3  ;;  %vm3029_vm9 = vcmp.lt.f32.partialorder %v3028_v21, 8388608.0 }
  0xea   : > { %v3038_v5 = vcvt.f32.s32 %v330_v63  ;;  %v3041_v29 = vand.u32 2147483648, %v330_v63 }
  0xeb   : > { %v1025_v23 = vpop.f32.mrf.mxu3  ;;  %v3032_v11 = vand.u32 2147483647, %v3031_v9 }
  0xec   : > { %v995_v26 = vpop.f32.mrf.mxu1  ;;  %v3608_v27 = vadd.f32 %v1025_v23, %v829_v16  ;;  %v3039_v10 = vcvt.s32.f32 %v3038_v5  ;;  %v3033_v16 = vand.u32 2147483648, %v329_v61 }
  0xed   : > { %v3610_v32 = vadd.f32 %v995_v26, %v817_v20  ;;  %v798_v33 = vpop.f32.mrf.mxu2  ;;  %v2621_v26 = vld [vmem:[#allocation2 + $0xa4] sm:$0xff] }
  0xee   : > { %v771_v38 = vpop.f32.mrf.mxu0  ;;  %v830_v43 = vadd.f32 %v3537_v45, %v798_v33  ;;  %v3040_v23 = vand.u32 2147483647, %v3039_v10  ;;  %v3034_v28 = vor.u32 %v3033_v16, %v3032_v11  ;;  %v2595_v33 = vld [vmem:[#allocation2 + $0x50] sm:$0xff] }
  0xef   : > { %2529 = vmatmul.msk.bf16.gmra.mxu1 %vm701_vm8, %v2632_v22  ;;  %v819_v7 = vadd.f32 %v3537_v45, %v771_v38  ;;  %v3036_v22 = vand.u32 2147483647, %v330_v63 }
  0xf0   : > { %v3042_v35 = vor.u32 %v3041_v29, %v3040_v23 }
  0xf1   : > { %2464 = vmatmul.msk.bf16.gmra.mxu0 %vm701_vm8, %v2620_v34  ;;  %vm3037_vm10 = vcmp.lt.f32.partialorder %v3036_v22, 8388608.0  ;;  %v3035_v34 = vsel %vm3029_vm9, %v3034_v28, %v329_v61 }
  0xf2   : > { %2334 = vmatmul.msk.bf16.gmra.mxu2 %vm701_vm8, %v2594_v39  ;;  %v437_v38 = vmax.f32 %v3035_v34, -128.0  ;;  %v3043_v41 = vsel %vm3037_vm10, %v3042_v35, %v330_v63 }
  0xf3   : > { %v1027_v49 = vpop.f32.mrf.mxu3  ;;  %v438_v36 = vmax.f32 %v3043_v41, -128.0 }
  0xf4   : > { %v997_v50 = vpop.f32.mrf.mxu1  ;;  %v3617_v51 = vadd.f32 %v1027_v49, %v830_v43  ;;  %v491_v43 = vmin.f32 %v437_v38, 127.0 }
  0xf5   : > { %v3621_v59 = vadd.f32 %v997_v50, %v818_v19  ;;  %v801_v60 = vpop.f32.mrf.mxu2  ;;  %v492_v48 = vmin.f32 %v438_v36, 127.0  ;;  %v277_v50 = vld [vmem:[%s3184_s27 + $0x190] sm:$0xff] }
  0xf6   : > { %v773_v0 = vpop.f32.mrf.mxu0  ;;  %v831_v6 = vadd.f32 %v3537_v45, %v801_v60  ;;  %v545_v49 = vpack.c.bf16 %v491_v43, %v491_v43  ;;  %v331_v56 = vmul.f32 16.0, %v277_v50  ;;  %v279_v50 = vld [vmem:[%s3184_s27 + $0x1a0] sm:$0xff] }
  0xf7   : > { %v820_v39 = vadd.f32 %v3537_v45, %v773_v0  ;;  %v546_v61 = vpack.c.bf16 %v492_v48, %v492_v48 }
  0xf8   : > { %2398 = vmatmul.msk.bf16.gmra.mxu3 %vm701_vm8, %v2607_v52  ;;  %v278_v52 = vld [vmem:[%s3184_s27 + $0x198] sm:$0xff]  ;;  %600 = vst.msk [vmem:[#allocation2 + $0xc0] sm:$0xf] %vm551_vm4, %v545_v49  ;;  %v3046_v63 = vcvt.f32.s32 %v331_v56  ;;  %v3044_v16 = vand.u32 2147483647, %v331_v56 }
  0xf9   : > { %v332_v57 = vmul.f32 16.0, %v278_v52  ;;  %601 = vst.msk [vmem:[#allocation2 + $0xc4] sm:$0xf] %vm551_vm4, %v546_v61  ;;  %v280_v52 = vld [vmem:[%s3184_s27 + $0x1a8] sm:$0xff] }
  0xfa   : > { %v3047_v5 = vcvt.s32.f32 %v3046_v63  ;;  %vm3045_vm11 = vcmp.lt.f32.partialorder %v3044_v16, 8388608.0 }
  0xfb   : > { %v1030_v13 = vpop.f32.mrf.mxu3  ;;  %v3054_v0 = vcvt.f32.s32 %v332_v57  ;;  %v3057_v28 = vand.u32 2147483648, %v332_v57 }
  0xfc   : > { %v1000_v20 = vpop.f32.mrf.mxu1  ;;  %v3628_v17 = vadd.f32 %v1030_v13, %v831_v6  ;;  %v3048_v10 = vand.u32 2147483647, %v3047_v5 }
  0xfd   : > { %v3630_v24 = vadd.f32 %v1000_v20, %v819_v7  ;;  %v803_v18 = vpop.f32.mrf.mxu2  ;;  %v3055_v6 = vcvt.s32.f32 %v3054_v0  ;;  %v2634_v7 = vld [vmem:[#allocation2 + $0xb0] sm:$0xff]  ;;  %v3052_v20 = vand.u32 2147483647, %v332_v57 }
  0xfe   : > { %v776_v31 = vpop.f32.mrf.mxu0  ;;  %v832_v37 = vadd.f32 %v3537_v45, %v803_v18  ;;  %v2622_v18 = vld [vmem:[#allocation2 + $0xac] sm:$0xff] }
  0xff   : > { %2530 = vmatmul.msk.bf16.gmra.mxu1 %vm701_vm8, %v2633_v12  ;;  %v821_v3 = vadd.f32 %v3537_v45, %v776_v31  ;;  %v3049_v12 = vand.u32 2147483648, %v331_v56  ;;  %v3056_v21 = vand.u32 2147483647, %v3055_v6  ;;  %v2596_v31 = vld [vmem:[#allocation2 + $0x58] sm:$0xff]  ;;  %vm3053_vm12 = vcmp.lt.f32.partialorder %v3052_v20, 8388608.0 }
 0x101   : > { %2465 = vmatmul.msk.bf16.gmra.mxu0 %vm701_vm8, %v2621_v26  ;;  %v3050_v26 = vor.u32 %v3049_v12, %v3048_v10  ;;  %v3058_v34 = vor.u32 %v3057_v28, %v3056_v21 }
 0x102   : > { %2335 = vmatmul.msk.bf16.gmra.mxu2 %vm701_vm8, %v2595_v33 }
 0x103   : > { %v1032_v44 = vpop.f32.mrf.mxu3  ;;  %v3051_v33 = vsel %vm3045_vm11, %v3050_v26, %v331_v56 }
 0x104   : > { %v1002_v19 = vpop.f32.mrf.mxu1  ;;  %v3637_v46 = vadd.f32 %v1032_v44, %v832_v37  ;;  %v439_v37 = vmax.f32 %v3051_v33, -128.0 }
 0x105   : > { %v3641_v53 = vadd.f32 %v1002_v19, %v820_v39  ;;  %v806_v55 = vpop.f32.mrf.mxu2  ;;  %v3059_v39 = vsel %vm3053_vm12, %v3058_v34, %v332_v57  ;;  %v333_v57 = vmul.f32 16.0, %v279_v50 }
 0x106   : > { %v778_v60 = vpop.f32.mrf.mxu0  ;;  %v833_v2 = vadd.f32 %v3537_v45, %v806_v55  ;;  %v440_v41 = vmax.f32 %v3059_v39, -128.0  ;;  %v493_v36 = vmin.f32 %v439_v37, 127.0 }
 0x107   : > { %v822_v38 = vadd.f32 %v3537_v45, %v778_v60  ;;  %v334_v60 = vmul.f32 16.0, %v280_v52  ;;  %v3065_v12 = vand.u32 2147483648, %v333_v57  ;;  %v3060_v16 = vand.u32 2147483647, %v333_v57 }
 0x108   : > { %2399 = vmatmul.msk.bf16.gmra.mxu3 %vm701_vm8, %v2608_v47  ;;  %v2609_v47 = vld [vmem:[#allocation2 + $0xa0] sm:$0xff]  ;;  %v494_v48 = vmin.f32 %v440_v41, 127.0  ;;  %v547_v49 = vpack.c.bf16 %v493_v36, %v493_v36 }
 0x109   : > { %v3068_v20 = vand.u32 2147483647, %v334_v60  ;;  %v3073_v28 = vand.u32 2147483648, %v334_v60  ;;  %vm3061_vm13 = vcmp.lt.f32.partialorder %v3060_v16, 8388608.0 }
 0x10a   : > { %v548_v0 = vpack.c.bf16 %v494_v48, %v494_v48  ;;  %602 = vst.msk [vmem:[#allocation2 + $0xc8] sm:$0xf] %vm551_vm4, %v547_v49  ;;  %v2610_v48 = vld [vmem:[#allocation2 + $0xa8] sm:$0xff] }
 0x10b   : > { %v1035_v9 = vpop.f32.mrf.mxu3  ;;  %vm3069_vm14 = vcmp.lt.f32.partialorder %v3068_v20, 8388608.0 }
 0x10c   : > { %v1005_v13 = vpop.f32.mrf.mxu1  ;;  %v3648_v11 = vadd.f32 %v1035_v9, %v833_v2  ;;  %v3062_v2 = vcvt.f32.s32 %v333_v57  ;;  %603 = vst.msk [vmem:[#allocation2 + $0xcc] sm:$0xf] %vm551_vm4, %v548_v0 }
 0x10d   : > { %v3650_v22 = vadd.f32 %v1005_v13, %v821_v3  ;;  %v808_v23 = vpop.f32.mrf.mxu2  ;;  %v3070_v3 = vcvt.f32.s32 %v334_v60 }
 0x10e   : > { %v1685_v29 = vpop.f32.mrf.mxu0  ;;  %v834_v35 = vadd.f32 %v3537_v45, %v808_v23  ;;  %v3063_v5 = vcvt.s32.f32 %v3062_v2  ;;  %v2636_v2 = vld [vmem:[#allocation2 + $0xc0] sm:$0xff] }
 0x10f   : > { %2531 = vmatmul.msk.bf16.gmra.mxu1 %vm701_vm8, %v2634_v7  ;;  %v3071_v6 = vcvt.s32.f32 %v3070_v3  ;;  %v2635_v7 = vld [vmem:[#allocation2 + $0xb8] sm:$0xff] }
 0x110   : > { %v3064_v10 = vand.u32 2147483647, %v3063_v5 }
 0x111   : > { %2466 = vmatmul.msk.bf16.gmra.mxu0 %vm701_vm8, %v2622_v18  ;;  %v3072_v21 = vand.u32 2147483647, %v3071_v6  ;;  %v2623_v18 = vld [vmem:[#allocation2 + $0xb4] sm:$0xff] }
 0x112   : > { %2336 = vmatmul.msk.bf16.gmra.mxu2 %vm701_vm8, %v2596_v31  ;;  %v3066_v26 = vor.u32 %v3065_v12, %v3064_v10  ;;  %v2598_v12 = vld [vmem:[#allocation2 + $0x68] sm:$0xff] }
 0x113   : > { %v1037_v43 = vpop.f32.mrf.mxu3 }
 0x114   : > { %v1007_v44 = vpop.f32.mrf.mxu1  ;;  %v3658_v19 = vadd.f32 %v1037_v43, %v834_v35  ;;  %v2597_v35 = vld [vmem:[#allocation2 + $0x60] sm:$0xff]  ;;  %v3067_v37 = vsel %vm3061_vm13, %v3066_v26, %v333_v57 }
 0x115   : > { %v3662_v55 = vadd.f32 %v1007_v44, %v822_v38  ;;  %v1209_v56 = vpop.f32.mrf.mxu2  ;;  %v3074_v38 = vor.u32 %v3073_v28, %v3072_v21  ;;  %v441_v41 = vmax.f32 %v3067_v37, -128.0  ;;  %v2611_v21 = vld [vmem:[#allocation2 + $0xb0] sm:$0xff] }
 0x116   : > { %v1269_v61 = vadd.f32 %v1209_v56, %v3550_v8  ;;  %v1687_v63 = vpop.f32.mrf.mxu0 }
 0x117   : > { %v3075_v36 = vsel %vm3069_vm14, %v3074_v38, %v334_v60  ;;  %v2625_v38 = vld [vmem:[#allocation2 + $0xc4] sm:$0xff] }
 0x118   : > { %2400 = vmatmul.msk.bf16.gmra.mxu3 %vm701_vm8, %v2609_v47  ;;  %1293 = vst [vmem:[%s3667_s12] sm:$0xff] %v1269_v61 }
 0x11b   : > { %v1457_v9 = vpop.f32.mrf.mxu3 }
 0x11c   : > { %v1913_v13 = vpop.f32.mrf.mxu1  ;;  %v1517_v8 = vadd.f32 %v3537_v45, %v1457_v9 }
 0x11d   : > { %v1211_v23 = vpop.f32.mrf.mxu2 }
 0x11e   : > { %v1745_v31 = vadd.f32 %v1685_v29, %v1517_v8  ;;  %v1270_v33 = vadd.f32 %v1211_v23, %v3558_v30  ;;  %v1690_v34 = vpop.f32.mrf.mxu0  ;;  %v442_v29 = vmax.f32 %v3075_v36, -128.0  ;;  %v495_v30 = vmin.f32 %v441_v41, 127.0 }
 0x11f   : > { %2532 = vmatmul.msk.bf16.gmra.mxu1 %vm701_vm8, %v2635_v7 }
 0x120   : > { %v1973_v39 = vadd.f32 %v1913_v13, %v1745_v31  ;;  %1294 = vst [vmem:[%s3667_s12 + $0x8] sm:$0xff] %v1270_v33  ;;  %v496_v49 = vmin.f32 %v442_v29, 127.0  ;;  %v549_v50 = vpack.c.bf16 %v495_v30, %v495_v30  ;;  %v2637_v31 = vld [vmem:[#allocation2 + $0xc8] sm:$0xff] }
 0x121   : > { %2467 = vmatmul.msk.bf16.gmra.mxu0 %vm701_vm8, %v2623_v18 }
 0x122   : > { %2536 = vst [vmem:[%s3667_s12 + $0xc0] sm:$0xff] %v1973_v39  ;;  %2337 = vmatmul.msk.bf16.gmra.mxu2 %vm701_vm8, %v2597_v35  ;;  %v550_v60 = vpack.c.bf16 %v496_v49, %v496_v49 }
 0x123   : > { %v1459_v43 = vpop.f32.mrf.mxu3  ;;  %604 = vst.msk [vmem:[#allocation2 + $0xd0] sm:$0xf] %vm551_vm4, %v549_v50 }
 0x124   : > { %v1915_v44 = vpop.f32.mrf.mxu1  ;;  %v1518_v47 = vadd.f32 %v3537_v45, %v1459_v43  ;;  %605 = vst.msk [vmem:[#allocation2 + $0xd4] sm:$0xf] %vm551_vm4, %v550_v60 }
 0x125   : > { %v1214_v52 = vpop.f32.mrf.mxu2 }
 0x126   : > { %v1746_v56 = vadd.f32 %v1687_v63, %v1518_v47  ;;  %v1271_v57 = vadd.f32 %v1214_v52, %v3570_v58  ;;  %v1692_v61 = vpop.f32.mrf.mxu0  ;;  %v2624_v58 = vld [vmem:[#allocation2 + $0xbc] sm:$0xff] }
 0x127   : > { %v2612_v47 = vld [vmem:[#allocation2 + $0xb8] sm:$0xff] }
 0x128   : > { %v1974_v0 = vadd.f32 %v1915_v44, %v1746_v56  ;;  %2401 = vmatmul.msk.bf16.gmra.mxu3 %vm701_vm8, %v2610_v48  ;;  %1295 = vst [vmem:[%s3667_s12 + $0x10] sm:$0xff] %v1271_v57 }
 0x12a   : > { %2537 = vst [vmem:[%s3667_s12 + $0xc8] sm:$0xff] %v1974_v0 }
 0x12b   : > { %v1462_v3 = vpop.f32.mrf.mxu3  ;;  %v2638_v56 = vld [vmem:[#allocation2 + $0xd0] sm:$0xff] }
 0x12c   : > { %v1918_v5 = vpop.f32.mrf.mxu1  ;;  %v1519_v63 = vadd.f32 %v3537_v45, %v1462_v3 }
 0x12d   : > { %v1216_v6 = vpop.f32.mrf.mxu2 }
 0x12e   : > { %v1747_v7 = vadd.f32 %v1690_v34, %v1519_v63  ;;  %v1272_v9 = vadd.f32 %v1216_v6, %v3581_v14  ;;  %v1695_v10 = vpop.f32.mrf.mxu0 }
 0x12f   : > { %2533 = vmatmul.msk.bf16.gmra.mxu1 %vm701_vm8, %v2636_v2 }
 0x130   : > { %v1975_v13 = vadd.f32 %v1918_v5, %v1747_v7  ;;  %1296 = vst [vmem:[%s3667_s12 + $0x18] sm:$0xff] %v1272_v9 }
 0x131   : > { %2468 = vmatmul.msk.bf16.gmra.mxu0 %vm701_vm8, %v2624_v58 }
 0x132   : > { %2538 = vst [vmem:[%s3667_s12 + $0xd0] sm:$0xff] %v1975_v13  ;;  %2338 = vmatmul.msk.bf16.gmra.mxu2 %vm701_vm8, %v2598_v12 }
 0x133   : > { %v1464_v8 = vpop.f32.mrf.mxu3 }
 0x134   : > { %v1920_v16 = vpop.f32.mrf.mxu1  ;;  %v1520_v20 = vadd.f32 %v3537_v45, %v1464_v8 }
 0x135   : > { %v1219_v23 = vpop.f32.mrf.mxu2 }
 0x136   : > { %v1748_v14 = vadd.f32 %v1692_v61, %v1520_v20  ;;  %v1273_v18 = vadd.f32 %v1219_v23, %v3590_v42  ;;  %v1697_v26 = vpop.f32.mrf.mxu0  ;;  %v2599_v42 = vld [vmem:[#allocation2 + $0x70] sm:$0xff] }
 0x138   : > { %v1976_v28 = vadd.f32 %v1920_v16, %v1748_v14  ;;  %2402 = vmatmul.msk.bf16.gmra.mxu3 %vm701_vm8, %v2611_v21  ;;  %1297 = vst [vmem:[%s3667_s12 + $0x20] sm:$0xff] %v1273_v18 }
 0x13a   : > { %2539 = vst [vmem:[%s3667_s12 + $0xd8] sm:$0xff] %v1976_v28 }
 0x13b   : > { %v1467_v33 = vpop.f32.mrf.mxu3 }
 0x13c   : > { %v1923_v34 = vpop.f32.mrf.mxu1  ;;  %v1521_v35 = vadd.f32 %v3537_v45, %v1467_v33 }
 0x13d   : > { %v1221_v37 = vpop.f32.mrf.mxu2 }
 0x13e   : > { %v1749_v39 = vadd.f32 %v1695_v10, %v1521_v35  ;;  %v1274_v41 = vadd.f32 %v1221_v37, %v3601_v4  ;;  %v1700_v36 = vpop.f32.mrf.mxu0 }
 0x13f   : > { %2534 = vmatmul.msk.bf16.gmra.mxu1 %vm701_vm8, %v2637_v31 }
 0x140   : > { %v1977_v29 = vadd.f32 %v1923_v34, %v1749_v39  ;;  %1298 = vst [vmem:[%s3667_s12 + $0x28] sm:$0xff] %v1274_v41 }
 0x141   : > { %2469 = vmatmul.msk.bf16.gmra.mxu0 %vm701_vm8, %v2625_v38 }
 0x142   : > { %2540 = vst [vmem:[%s3667_s12 + $0xe0] sm:$0xff] %v1977_v29  ;;  %2339 = vmatmul.msk.bf16.gmra.mxu2 %vm701_vm8, %v2599_v42 }
 0x143   : > { %v1469_v30 = vpop.f32.mrf.mxu3 }
 0x144   : > { %v1925_v43 = vpop.f32.mrf.mxu1  ;;  %v1522_v44 = vadd.f32 %v3537_v45, %v1469_v30 }
 0x145   : > { %v1224_v48 = vpop.f32.mrf.mxu2 }
 0x146   : > { %v1750_v4 = vadd.f32 %v1697_v26, %v1522_v44  ;;  %v1275_v49 = vadd.f32 %v1224_v48, %v3610_v32  ;;  %v1702_v50 = vpop.f32.mrf.mxu0 }
 0x148   : > { %v1978_v52 = vadd.f32 %v1925_v43, %v1750_v4  ;;  %2403 = vmatmul.msk.bf16.gmra.mxu3 %vm701_vm8, %v2612_v47  ;;  %1299 = vst [vmem:[%s3667_s12 + $0x30] sm:$0xff] %v1275_v49 }
 0x14a   : > { %2541 = vst [vmem:[%s3667_s12 + $0xe8] sm:$0xff] %v1978_v52 }
 0x14b   : > { %v1472_v57 = vpop.f32.mrf.mxu3 }
 0x14c   : > { %v1928_v61 = vpop.f32.mrf.mxu1  ;;  %v1523_v60 = vadd.f32 %v3537_v45, %v1472_v57 }
 0x14d   : > { %v1226_v0 = vpop.f32.mrf.mxu2 }
 0x14e   : > { %v1751_v2 = vadd.f32 %v1700_v36, %v1523_v60  ;;  %v1276_v3 = vadd.f32 %v1226_v0, %v3621_v59  ;;  %v1705_v32 = vpop.f32.mrf.mxu0 }
 0x14f   : > { %2535 = vmatmul.msk.bf16.gmra.mxu1 %vm701_vm8, %v2638_v56 }
 0x150   : > { %v1979_v5 = vadd.f32 %v1928_v61, %v1751_v2  ;;  %1300 = vst [vmem:[%s3667_s12 + $0x38] sm:$0xff] %v1276_v3 }
 0x152   : > { %2542 = vst [vmem:[%s3667_s12 + $0xf0] sm:$0xff] %v1979_v5 }
 0x153   : > { %v1474_v63 = vpop.f32.mrf.mxu3 }
 0x154   : > { %v1930_v6 = vpop.f32.mrf.mxu1  ;;  %v1524_v58 = vadd.f32 %v3537_v45, %v1474_v63 }
 0x155   : > { %v1229_v7 = vpop.f32.mrf.mxu2 }
 0x156   : > { %v1752_v9 = vadd.f32 %v1702_v50, %v1524_v58  ;;  %v1277_v10 = vadd.f32 %v1229_v7, %v3630_v24  ;;  %v1707_v12 = vpop.f32.mrf.mxu0 }
 0x158   : > { %v1980_v13 = vadd.f32 %v1930_v6, %v1752_v9  ;;  %1301 = vst [vmem:[%s3667_s12 + $0x40] sm:$0xff] %v1277_v10 }
 0x15a   : > { %2543 = vst [vmem:[%s3667_s12 + $0xf8] sm:$0xff] %v1980_v13 }
 0x15b   : > { %v1477_v59 = vpop.f32.mrf.mxu3 }
 0x15c   : > { %v1933_v8 = vpop.f32.mrf.mxu1  ;;  %v1525_v16 = vadd.f32 %v3537_v45, %v1477_v59 }
 0x15d   : > { %v1231_v20 = vpop.f32.mrf.mxu2 }
 0x15e   : > { %v1753_v21 = vadd.f32 %v1705_v32, %v1525_v16  ;;  %v1278_v23 = vadd.f32 %v1231_v20, %v3641_v53  ;;  %v1710_v14 = vpop.f32.mrf.mxu0  ;;  %v3744_v32 = vld [vmem:[%s3799_s2] ss:$0 sm:$0xff] }
 0x160   : > { %v1981_v18 = vadd.f32 %v1933_v8, %v1753_v21  ;;  %1302 = vst [vmem:[%s3667_s12 + $0x48] sm:$0xff] %v1278_v23 }
 0x162   : > { %2544 = vst [vmem:[%s3667_s12 + $0x100] sm:$0xff] %v1981_v18 }
 0x163   : > { %v1479_v26 = vpop.f32.mrf.mxu3 }
 0x164   : > { %v1935_v24 = vpop.f32.mrf.mxu1  ;;  %v1526_v28 = vadd.f32 %v3537_v45, %v1479_v26 }
 0x165   : > { %v1234_v31 = vpop.f32.mrf.mxu2 }
 0x166   : > { %v1754_v33 = vadd.f32 %v1707_v12, %v1526_v28  ;;  %v1279_v34 = vadd.f32 %v1234_v31, %v3650_v22  ;;  %v1712_v35 = vpop.f32.mrf.mxu0 }
 0x168   : > { %v1982_v37 = vadd.f32 %v1935_v24, %v1754_v33  ;;  %1303 = vst [vmem:[%s3667_s12 + $0x50] sm:$0xff] %v1279_v34 }
 0x16a   : > { %2545 = vst [vmem:[%s3667_s12 + $0x108] sm:$0xff] %v1982_v37 }
 0x16b   : > { %v1482_v38 = vpop.f32.mrf.mxu3 }
 0x16c   : > { %v1938_v53 = vpop.f32.mrf.mxu1  ;;  %v1527_v39 = vadd.f32 %v3537_v45, %v1482_v38 }
 0x16d   : > { %v1236_v41 = vpop.f32.mrf.mxu2 }
 0x16e   : > { %v1755_v36 = vadd.f32 %v1710_v14, %v1527_v39  ;;  %v1280_v42 = vadd.f32 %v1236_v41, %v3662_v55  ;;  %v1715_v29 = vpop.f32.mrf.mxu0 }
 0x170   : > { %v1983_v30 = vadd.f32 %v1938_v53, %v1755_v36  ;;  %1304 = vst [vmem:[%s3667_s12 + $0x58] sm:$0xff] %v1280_v42 }
 0x172   : > { %2546 = vst [vmem:[%s3667_s12 + $0x110] sm:$0xff] %v1983_v30 }
 0x173   : > { %v1484_v43 = vpop.f32.mrf.mxu3 }
 0x174   : > { %v1940_v22 = vpop.f32.mrf.mxu1  ;;  %v1528_v44 = vadd.f32 %v3537_v45, %v1484_v43 }
 0x175   : > { %v1239_v47 = vpop.f32.mrf.mxu2 }
 0x176   : > { %v1756_v48 = vadd.f32 %v1712_v35, %v1528_v44  ;;  %v1281_v4 = vadd.f32 %v1239_v47, %v3546_v1  ;;  %v1717_v49 = vpop.f32.mrf.mxu0 }
 0x178   : > { %v1984_v50 = vadd.f32 %v1940_v22, %v1756_v48  ;;  %1305 = vst [vmem:[%s3667_s12 + $0x60] sm:$0xff] %v1281_v4 }
 0x17a   : > { %2547 = vst [vmem:[%s3667_s12 + $0x118] sm:$0xff] %v1984_v50 }
 0x17b   : > { %v1487_v52 = vpop.f32.mrf.mxu3 }
 0x17c   : > { %v1943_v55 = vpop.f32.mrf.mxu1  ;;  %v1529_v56 = vadd.f32 %v3537_v45, %v1487_v52 }
 0x17d   : > { %v1241_v57 = vpop.f32.mrf.mxu2 }
 0x17e   : > { %v1757_v61 = vadd.f32 %v1715_v29, %v1529_v56  ;;  %v1282_v60 = vadd.f32 %v1241_v57, %v3555_v25  ;;  %v1720_v0 = vpop.f32.mrf.mxu0 }
 0x180   : > { %v1985_v2 = vadd.f32 %v1943_v55, %v1757_v61  ;;  %1306 = vst [vmem:[%s3667_s12 + $0x68] sm:$0xff] %v1282_v60 }
 0x182   : > { %2548 = vst [vmem:[%s3667_s12 + $0x120] sm:$0xff] %v1985_v2 }
 0x183   : > { %v1489_v3 = vpop.f32.mrf.mxu3 }
 0x184   : > { %v1945_v1 = vpop.f32.mrf.mxu1  ;;  %v1530_v5 = vadd.f32 %v3744_v32, %v1489_v3 }
 0x185   : > { %v1244_v45 = vpop.f32.mrf.mxu2 }
 0x186   : > { %v1758_v63 = vadd.f32 %v1717_v49, %v1530_v5  ;;  %v1283_v6 = vadd.f32 %v1244_v45, %v3568_v54  ;;  %v1722_v25 = vpop.f32.mrf.mxu0 }
 0x188   : > { %v1986_v58 = vadd.f32 %v1945_v1, %v1758_v63  ;;  %1307 = vst [vmem:[%s3667_s12 + $0x70] sm:$0xff] %v1283_v6 }
 0x18a   : > { %2549 = vst [vmem:[%s3667_s12 + $0x128] sm:$0xff] %v1986_v58 }
 0x18b   : > { %v1492_v7 = vpop.f32.mrf.mxu3 }
 0x18c   : > { %v1948_v9 = vpop.f32.mrf.mxu1  ;;  %v1531_v10 = vadd.f32 %v3744_v32, %v1492_v7 }
 0x18d   : > { %v1246_v12 = vpop.f32.mrf.mxu2 }
 0x18e   : > { %v1759_v13 = vadd.f32 %v1720_v0, %v1531_v10  ;;  %v1284_v59 = vadd.f32 %v1246_v12, %v3577_v15  ;;  %v1725_v8 = vpop.f32.mrf.mxu0 }
 0x190   : > { %v1987_v16 = vadd.f32 %v1948_v9, %v1759_v13  ;;  %1308 = vst [vmem:[%s3667_s12 + $0x78] sm:$0xff] %v1284_v59 }
 0x192   : > { %2550 = vst [vmem:[%s3667_s12 + $0x130] sm:$0xff] %v1987_v16 }
 0x193   : > { %v1494_v20 = vpop.f32.mrf.mxu3 }
 0x194   : > { %v1950_v54 = vpop.f32.mrf.mxu1  ;;  %v1532_v21 = vadd.f32 %v3744_v32, %v1494_v20 }
 0x195   : > { %v1249_v23 = vpop.f32.mrf.mxu2 }
 0x196   : > { %v1760_v14 = vadd.f32 %v1722_v25, %v1532_v21  ;;  %v1285_v18 = vadd.f32 %v1249_v23, %v3588_v40  ;;  %v1727_v24 = vpop.f32.mrf.mxu0 }
 0x198   : > { %v1988_v26 = vadd.f32 %v1950_v54, %v1760_v14  ;;  %1309 = vst [vmem:[%s3667_s12 + $0x80] sm:$0xff] %v1285_v18 }
 0x19a   : > { %2551 = vst [vmem:[%s3667_s12 + $0x138] sm:$0xff] %v1988_v26 }
 0x19b   : > { %v1497_v28 = vpop.f32.mrf.mxu3 }
 0x19c   : > { %v1953_v15 = vpop.f32.mrf.mxu1  ;;  %v1533_v31 = vadd.f32 %v3744_v32, %v1497_v28 }
 0x19d   : > { %v1251_v33 = vpop.f32.mrf.mxu2 }
 0x19e   : > { %v1761_v34 = vadd.f32 %v1725_v8, %v1533_v31  ;;  %v1286_v35 = vadd.f32 %v1251_v33, %v3597_v62  ;;  %v1730_v53 = vpop.f32.mrf.mxu0 }
 0x1a0   : > { %v1989_v37 = vadd.f32 %v1953_v15, %v1761_v34  ;;  %1310 = vst [vmem:[%s3667_s12 + $0x88] sm:$0xff] %v1286_v35 }
 0x1a2   : > { %2552 = vst [vmem:[%s3667_s12 + $0x140] sm:$0xff] %v1989_v37 }
 0x1a3   : > { %v1499_v38 = vpop.f32.mrf.mxu3 }
 0x1a4   : > { %v1955_v40 = vpop.f32.mrf.mxu1  ;;  %v1534_v39 = vadd.f32 %v3744_v32, %v1499_v38 }
 0x1a5   : > { %v1254_v41 = vpop.f32.mrf.mxu2 }
 0x1a6   : > { %v1762_v36 = vadd.f32 %v1727_v24, %v1534_v39  ;;  %v1287_v42 = vadd.f32 %v1254_v41, %v3608_v27  ;;  %v1732_v22 = vpop.f32.mrf.mxu0 }
 0x1a8   : > { %v1990_v29 = vadd.f32 %v1955_v40, %v1762_v36  ;;  %1311 = vst [vmem:[%s3667_s12 + $0x90] sm:$0xff] %v1287_v42 }
 0x1aa   : > { %2553 = vst [vmem:[%s3667_s12 + $0x148] sm:$0xff] %v1990_v29 }
 0x1ab   : > { %v1502_v30 = vpop.f32.mrf.mxu3 }
 0x1ac   : > { %v1958_v43 = vpop.f32.mrf.mxu1  ;;  %v1535_v62 = vadd.f32 %v3744_v32, %v1502_v30 }
 0x1ad   : > { %v1256_v44 = vpop.f32.mrf.mxu2 }
 0x1ae   : > { %v1763_v47 = vadd.f32 %v1730_v53, %v1535_v62  ;;  %v1288_v48 = vadd.f32 %v1256_v44, %v3617_v51  ;;  %v1735_v57 = vpop.f32.mrf.mxu0 }
 0x1b0   : > { %v1991_v4 = vadd.f32 %v1958_v43, %v1763_v47  ;;  %1312 = vst [vmem:[%s3667_s12 + $0x98] sm:$0xff] %v1288_v48 }
 0x1b2   : > { %2554 = vst [vmem:[%s3667_s12 + $0x150] sm:$0xff] %v1991_v4 }
 0x1b3   : > { %v1504_v49 = vpop.f32.mrf.mxu3 }
 0x1b4   : > { %v1960_v50 = vpop.f32.mrf.mxu1  ;;  %v1536_v27 = vadd.f32 %v3744_v32, %v1504_v49 }
 0x1b5   : > { %v1259_v52 = vpop.f32.mrf.mxu2 }
 0x1b6   : > { %v1764_v55 = vadd.f32 %v1732_v22, %v1536_v27  ;;  %v1289_v56 = vadd.f32 %v1259_v52, %v3628_v17  ;;  %v1737_v45 = vpop.f32.mrf.mxu0 }
 0x1b8   : > { %v1992_v61 = vadd.f32 %v1960_v50, %v1764_v55  ;;  %1313 = vst [vmem:[%s3667_s12 + $0xa0] sm:$0xff] %v1289_v56 }
 0x1ba   : > { %2555 = vst [vmem:[%s3667_s12 + $0x158] sm:$0xff] %v1992_v61 }
 0x1bb   : > { %v1507_v60 = vpop.f32.mrf.mxu3 }
 0x1bc   : > { %v1963_v0 = vpop.f32.mrf.mxu1  ;;  %v1537_v51 = vadd.f32 %v3744_v32, %v1507_v60 }
 0x1bd   : > { %v1261_v2 = vpop.f32.mrf.mxu2 }
 0x1be   : > { %v1765_v3 = vadd.f32 %v1735_v57, %v1537_v51  ;;  %v1290_v1 = vadd.f32 %v1261_v2, %v3637_v46  ;;  %v1740_v10 = vpop.f32.mrf.mxu0 }
 0x1c0   : > { %v1993_v5 = vadd.f32 %v1963_v0, %v1765_v3  ;;  %1314 = vst [vmem:[%s3667_s12 + $0xa8] sm:$0xff] %v1290_v1 }
 0x1c2   : > { %2556 = vst [vmem:[%s3667_s12 + $0x160] sm:$0xff] %v1993_v5 }
 0x1c3   : > { %v1509_v63 = vpop.f32.mrf.mxu3 }
 0x1c4   : > { %v1965_v17 = vpop.f32.mrf.mxu1  ;;  %v1538_v6 = vadd.f32 %v3744_v32, %v1509_v63 }
 0x1c5   : > { %v1264_v25 = vpop.f32.mrf.mxu2 }
 0x1c6   : > { %v1766_v58 = vadd.f32 %v1737_v45, %v1538_v6  ;;  %v1291_v7 = vadd.f32 %v1264_v25, %v3648_v11  ;;  %v1742_v11 = vpop.f32.mrf.mxu0 }
 0x1c8   : > { %v1994_v9 = vadd.f32 %v1965_v17, %v1766_v58  ;;  %1315 = vst [vmem:[%s3667_s12 + $0xb0] sm:$0xff] %v1291_v7 }
 0x1ca   : > { %2557 = vst [vmem:[%s3667_s12 + $0x168] sm:$0xff] %v1994_v9 }
 0x1cb   : > { %v1512_v46 = vpop.f32.mrf.mxu3 }
 0x1cc   : > { %v1539_v12 = vadd.f32 %v3744_v32, %v1512_v46  ;;  %v1968_v13 = vpop.f32.mrf.mxu1 }
 0x1cd   : > { %v1266_v59 = vpop.f32.mrf.mxu2 }
 0x1ce   : > { %v1767_v8 = vadd.f32 %v1740_v10, %v1539_v12  ;;  %v1292_v16 = vadd.f32 %v1266_v59, %v3658_v19 }
 0x1d0   : > { %v1995_v20 = vadd.f32 %v1968_v13, %v1767_v8  ;;  %1316 = vst [vmem:[%s3667_s12 + $0xb8] sm:$0xff] %v1292_v16 }
 0x1d2   : > { %2558 = vst [vmem:[%s3667_s12 + $0x170] sm:$0xff] %v1995_v20 }
 0x1d3   : > { %v1514_v54 = vpop.f32.mrf.mxu3 }
 0x1d4   : > { %v1540_v21 = vadd.f32 %v3744_v32, %v1514_v54  ;;  %v1970_v14 = vpop.f32.mrf.mxu1 }
 0x1d6   : > { %v1768_v23 = vadd.f32 %v1742_v11, %v1540_v21 }
 0x1d8   : > { %v1996_v18 = vadd.f32 %v1970_v14, %v1768_v23 }
 0x1da   : > { %2559 = vst [vmem:[%s3667_s12 + $0x178] sm:$0xff] %v1996_v18 }
 0x1db PF: > { %s13_s14 = sadd.s32 1, %s3124_s14   ;;  %s3855_s12 = smov %s3120_s13 }
 0x1dc   : > { %p10_p5 = scmp.ge.s32.totalorder %s13_s14, 4   ;;  %s3856_s13 = smov %s3858_s15 }
 0x1de   :  { %12 = sbr.rel (!%p10_p5) target bundleno = 2 (0x2), region = 80 }

</bundles_post_ra>
